<compile_context>
chip_gen: v6e
topology: v6e:2x2x1
jax: 0.10.0
libtpu: 0.0.40
codegen_flags: <defaults>
</compile_context>

<pallas_src>
import functools

import jax
import jax.numpy as jnp
from jax import lax
from jax.experimental import pallas as pl
from jax.experimental.pallas import tpu as pltpu

# ----------------------------- config (small, synthetic) --------------------
SEQ_LEN = 8            # T
BATCH = 2              # B
ENC_DIM = 32           # encoder_embed_dim  (E)
REENC_DIM = 64         # reencoder_embed_dim (D)  != E  -> in/out proj present
NUM_HEADS = 4          # H
HEAD_DIM = REENC_DIM // NUM_HEADS
FFN_DIM = 128          # reencoder_ffn_embed_dim
NUM_LAYERS = 2         # reencoder_layers
LN_EPS = 1e-5
NEG_INF = -1e30

# TODO(synk): dropout / reencoder_layerdrop are identity in eval mode and omitted.
# TODO(synk): reencoder_normalize_before=False assumed, so ReEncoder.layer_norm is None.
# NOTE: rows whose queries are fully padded produce a uniform softmax over
#       -1e30 entries (finite garbage) exactly like fairseq; downstream code
#       is expected to ignore padded rows.


# ----------------------------- fused kernel ---------------------------------
def _layer_norm(y, g, b):
    # f32 statistics (do NOT move these to bf16)
    mean = jnp.mean(y, axis=-1, keepdims=True)
    var = jnp.mean(jnp.square(y - mean), axis=-1, keepdims=True)
    return (y - mean) * lax.rsqrt(var + LN_EPS) * g + b


def _reencoder_kernel(x_ref, keypad_ref,
                      in_w_ref, in_b_ref,
                      wqkv_ref, bqkv_ref, wo_ref, bo_ref,
                      ln1_g_ref, ln1_b_ref,
                      w1_ref, b1_ref, w2_ref, b2_ref,
                      ln2_g_ref, ln2_b_ref,
                      out_w_ref, out_b_ref,
                      o_ref, *, n_rows, n_batch, n_heads, head_dim, n_layers):
    d = n_heads * head_dim

    # ---- in_proj: (N, E) @ (E, D) -> (N, D), bf16 GEMM / f32 accumulate ----
    x = jnp.dot(x_ref[...].astype(jnp.bfloat16), in_w_ref[...],
                preferred_element_type=jnp.float32) + in_b_ref[...]

    # ---- additive attention bias rebuilt in-kernel (never touches HBM) -----
    # row r = t*B + b  (T-major layout)  ->  batch id = r % B
    row_ids = lax.broadcasted_iota(jnp.int32, (n_rows, n_rows), 0)
    col_ids = lax.broadcasted_iota(jnp.int32, (n_rows, n_rows), 1)
    same_batch = (row_ids % n_batch) == (col_ids % n_batch)
    attn_bias = (jnp.where(same_batch, 0.0, NEG_INF)
                 + keypad_ref[...] * NEG_INF)                     # (N, N) f32

    # (1, D) per-head column masks — tiny, one vreg each (NOT (N, D) slabs)
    col_d = lax.broadcasted_iota(jnp.int32, (1, d), 1)
    head_masks = [
        ((col_d >= hi * head_dim) & (col_d < (hi + 1) * head_dim)
         ).astype(jnp.float32)
        for hi in range(n_heads)
    ]

    for li in range(n_layers):
        # ---------------- self-attention block (post-norm) ------------------
        residual = x
        # fused QKV GEMM: (N, D) @ (D, 3D) -> (N, 3D); 1/sqrt(hd) is already
        # folded into the Q slice of wqkv/bqkv.
        qkv = jnp.dot(x.astype(jnp.bfloat16), wqkv_ref[li],
                      preferred_element_type=jnp.float32) + bqkv_ref[li]
        q = qkv[:, :d]
        k_b = qkv[:, d:2 * d].astype(jnp.bfloat16)
        v = qkv[:, 2 * d:]

        p_blocks = []      # per-head probabilities, lane-concatenated later
        v_blocks = []      # per-head masked V, row-concatenated later
        for hi in range(n_heads):
            # full-width contraction with a masked Q: no 16-lane slices
            q_b = (q * head_masks[hi]).astype(jnp.bfloat16)       # (N, D)
            s = lax.dot_general(q_b, k_b, (((1,), (1,)), ((), ())),
                                preferred_element_type=jnp.float32)  # (N, N)
            s = s + attn_bias
            s = s - jnp.max(s, axis=-1, keepdims=True)
            p = jnp.exp(s)
            p = p / jnp.sum(p, axis=-1, keepdims=True)            # exact
            p_blocks.append(p.astype(jnp.bfloat16))
            v_blocks.append((v * head_masks[hi]).astype(jnp.bfloat16))

        # merged P @ V for all heads: (N, H*N) @ (H*N, D) -> one MXU push
        p_cat = jnp.concatenate(p_blocks, axis=1)
        v_cat = jnp.concatenate(v_blocks, axis=0)
        attn = jnp.dot(p_cat, v_cat, preferred_element_type=jnp.float32)

        attn = jnp.dot(attn.astype(jnp.bfloat16), wo_ref[li],
                       preferred_element_type=jnp.float32) + bo_ref[li]
        x = _layer_norm(attn + residual, ln1_g_ref[li], ln1_b_ref[li])

        # ---------------- feed-forward block (post-norm) --------------------
        residual = x
        hdn = jnp.dot(x.astype(jnp.bfloat16), w1_ref[li],
                      preferred_element_type=jnp.float32) + b1_ref[li]
        hdn = jnp.maximum(hdn, 0.0)
        hdn = jnp.dot(hdn.astype(jnp.bfloat16), w2_ref[li],
                      preferred_element_type=jnp.float32) + b2_ref[li]
        x = _layer_norm(hdn + residual, ln2_g_ref[li], ln2_b_ref[li])

    # ---- out_proj: (N, D) @ (D, E) -> (N, E) --------------------------------
    o_ref[...] = (jnp.dot(x.astype(jnp.bfloat16), out_w_ref[...],
                          preferred_element_type=jnp.float32)
                  + out_b_ref[...]).astype(o_ref.dtype)


# ----------------------------- model wrapper ---------------------------------
def multilingual_reencoder_forward(src_tokens_prev_features,
                                   src_tokens_padding_masking,
                                   params,
                                   src_lang=None, tgt_lang=None,
                                   src_lengths=None,
                                   return_all_hiddens=False):
    """Equivalent of Multilingual_Reencoder.forward (the 'all' family path)."""
    t, b, e = src_tokens_prev_features.shape
    d = params["in_w"].shape[1]
    n = b * t

    # T-major flatten: (T, B, E) -> (T*B, E)   (NO transpose, just a reshape)
    x_tb = src_tokens_prev_features.reshape(n, e)

    # (1, N) key-padding row in T-major order; only the tiny (B, T) bool mask
    # gets transposed on the host side.
    keypad = src_tokens_padding_masking.astype(jnp.float32).T.reshape(1, n)

    operands = (
        x_tb, keypad,
        params["in_w"], params["in_b"].reshape(1, d),
        params["wqkv"], params["bqkv"],
        params["wo"], params["bo"],
        params["ln1_g"], params["ln1_b"],
        params["w1"], params["b1"],
        params["w2"], params["b2"],
        params["ln2_g"], params["ln2_b"],
        params["out_w"], params["out_b"].reshape(1, e),
    )

    # cost estimate (helps XLA schedule around the fused custom call)
    flops = 2 * n * e * d                                   # in_proj
    per_layer = (2 * n * d * (3 * d)                        # fused QKV GEMM
                 + NUM_HEADS * 2 * n * n * d                # masked full-D scores
                 + 2 * n * (NUM_HEADS * n) * d              # merged P @ V
                 + 2 * n * d * d                            # out proj
                 + 2 * n * d * FFN_DIM                      # FFN up
                 + 2 * n * FFN_DIM * d)                     # FFN down
    flops += NUM_LAYERS * per_layer
    flops += 2 * n * d * e                                  # out_proj
    transcendentals = NUM_LAYERS * (NUM_HEADS * n * n       # exp
                                    + NUM_HEADS * n         # softmax divide
                                    + 2 * n)                # rsqrt
    bytes_accessed = sum(int(a.size) * a.dtype.itemsize for a in operands)
    bytes_accessed += n * e * 4                             # output

    vmem = pl.BlockSpec(memory_space=pltpu.MemorySpace.VMEM)
    out2d = pl.pallas_call(
        functools.partial(_reencoder_kernel,
                          n_rows=n, n_batch=b, n_heads=NUM_HEADS,
                          head_dim=HEAD_DIM, n_layers=NUM_LAYERS),
        out_shape=jax.ShapeDtypeStruct((n, e), src_tokens_prev_features.dtype),
        in_specs=[vmem] * len(operands),
        out_specs=vmem,
        cost_estimate=pl.CostEstimate(flops=int(flops),
                                      transcendentals=int(transcendentals),
                                      bytes_accessed=int(bytes_accessed)),
    )(*operands)

    # back to fairseq (T, B, E) layout — plain reshape, no transpose
    x_out = out2d.reshape(t, b, e)

    return {
        "encoder_out": [x_out],
        "encoder_padding_mask": [src_tokens_padding_masking],
        "encoder_embedding": [],
        "encoder_states": [],
        "src_tokens": [],
        "src_lengths": [],
    }


# ----------------------------- deterministic params --------------------------
def init_params(key):
    """Weight slabs are packed bf16 (native MXU dtype); biases / LN stay f32.
    The 1/sqrt(head_dim) attention scale is folded into Wq / bq here."""
    scale = HEAD_DIM ** -0.5

    def dense(k, din, dout):
        kw, kb = jax.random.split(k)
        w = jax.random.normal(kw, (din, dout), jnp.float32) * 0.02
        bb = jax.random.normal(kb, (dout,), jnp.float32) * 0.02
        return w, bb

    keys = jax.random.split(key, 2 + NUM_LAYERS)
    params = {}
    in_w, in_b = dense(keys[0], ENC_DIM, REENC_DIM)
    out_w, out_b = dense(keys[1], REENC_DIM, ENC_DIM)
    params["in_w"] = in_w.astype(jnp.bfloat16)
    params["in_b"] = in_b
    params["out_w"] = out_w.astype(jnp.bfloat16)
    params["out_b"] = out_b

    wqkv, bqkv, wo, bo = [], [], [], []
    w1, b1, w2, b2 = [], [], [], []
    ln1g, ln1b, ln2g, ln2b = [], [], [], []
    for li in range(NUM_LAYERS):
        lk = jax.random.split(keys[2 + li], 6)
        wq, bq = dense(lk[0], REENC_DIM, REENC_DIM)
        wk, bk = dense(lk[1], REENC_DIM, REENC_DIM)
        wv, bv = dense(lk[2], REENC_DIM, REENC_DIM)
        # fold softmax scale into Q projection (one-time packing cost)
        wqkv.append(jnp.concatenate([wq * scale, wk, wv], axis=1))      # (D, 3D)
        bqkv.append(jnp.concatenate([bq * scale, bk, bv], axis=0)[None, :])
        w, bb = dense(lk[3], REENC_DIM, REENC_DIM)
        wo.append(w); bo.append(bb[None, :])
        w, bb = dense(lk[4], REENC_DIM, FFN_DIM)
        w1.append(w); b1.append(bb[None, :])
        w, bb = dense(lk[5], FFN_DIM, REENC_DIM)
        w2.append(w); b2.append(bb[None, :])
        ln1g.append(jnp.ones((1, REENC_DIM), jnp.float32))
        ln1b.append(jnp.zeros((1, REENC_DIM), jnp.float32))
        ln2g.append(jnp.ones((1, REENC_DIM), jnp.float32))
        ln2b.append(jnp.zeros((1, REENC_DIM), jnp.float32))

    params["wqkv"] = jnp.stack(wqkv).astype(jnp.bfloat16)   # (L, D, 3D)
    params["bqkv"] = jnp.stack(bqkv)                        # (L, 1, 3D) f32
    params["wo"] = jnp.stack(wo).astype(jnp.bfloat16)       # (L, D, D)
    params["bo"] = jnp.stack(bo)                            # (L, 1, D)  f32
    params["ln1_g"] = jnp.stack(ln1g)                       # (L, 1, D)  f32
    params["ln1_b"] = jnp.stack(ln1b)
    params["w1"] = jnp.stack(w1).astype(jnp.bfloat16)       # (L, D, F)
    params["b1"] = jnp.stack(b1)                            # (L, 1, F)  f32
    params["w2"] = jnp.stack(w2).astype(jnp.bfloat16)       # (L, F, D)
    params["b2"] = jnp.stack(b2)                            # (L, 1, D)  f32
    params["ln2_g"] = jnp.stack(ln2g)
    params["ln2_b"] = jnp.stack(ln2b)
    return params


# ----------------------------- main ------------------------------------------
if __name__ == "__main__":
    key = jax.random.PRNGKey(0)
    k_x, k_p = jax.random.split(key)

    # layout: (T, B, E) features, (B, T) bool padding mask (True = pad)
    x = jax.random.normal(k_x, (SEQ_LEN, BATCH, ENC_DIM), jnp.float32)
    lengths = jnp.array([SEQ_LEN, SEQ_LEN - 2], jnp.int32)
    pad_mask = jnp.arange(SEQ_LEN)[None, :] >= lengths[:, None]   # (B, T) bool

    params = init_params(k_p)

    out = multilingual_reencoder_forward(x, pad_mask, params)
    enc_out = jax.block_until_ready(out["encoder_out"][0])

    assert enc_out.shape == (SEQ_LEN, BATCH, ENC_DIM)
    assert bool(jnp.all(jnp.isfinite(enc_out)))
    print("KERNEL_OK")
</pallas_src>

<mosaic_0001>
module attributes {stable_mosaic.version = 11 : i64} {
  func.func @_reencoder_kernel(%arg0: memref<16x32xf32, #tpu.memory_space<vmem>>, %arg1: memref<1x16xf32, #tpu.memory_space<vmem>>, %arg2: memref<32x64xbf16, #tpu.memory_space<vmem>>, %arg3: memref<1x64xf32, #tpu.memory_space<vmem>>, %arg4: memref<2x64x192xbf16, #tpu.memory_space<vmem>>, %arg5: memref<2x1x192xf32, #tpu.memory_space<vmem>>, %arg6: memref<2x64x64xbf16, #tpu.memory_space<vmem>>, %arg7: memref<2x1x64xf32, #tpu.memory_space<vmem>>, %arg8: memref<2x1x64xf32, #tpu.memory_space<vmem>>, %arg9: memref<2x1x64xf32, #tpu.memory_space<vmem>>, %arg10: memref<2x64x128xbf16, #tpu.memory_space<vmem>>, %arg11: memref<2x1x128xf32, #tpu.memory_space<vmem>>, %arg12: memref<2x128x64xbf16, #tpu.memory_space<vmem>>, %arg13: memref<2x1x64xf32, #tpu.memory_space<vmem>>, %arg14: memref<2x1x64xf32, #tpu.memory_space<vmem>>, %arg15: memref<2x1x64xf32, #tpu.memory_space<vmem>>, %arg16: memref<64x32xbf16, #tpu.memory_space<vmem>>, %arg17: memref<1x32xf32, #tpu.memory_space<vmem>>, %arg18: memref<16x32xf32, #tpu.memory_space<vmem>>) attributes {dimension_semantics = [], scalar_prefetch = 0 : i64, scratch_operands = 0 : i64, tpu.core_type = #tpu.core_type<tc>} {
    %c0 = arith.constant 0 : index
    %c0_0 = arith.constant 0 : index
    %0 = vector.load %arg0[%c0, %c0_0] : memref<16x32xf32, #tpu.memory_space<vmem>>, vector<16x32xf32>
    %1 = arith.truncf %0 : vector<16x32xf32> to vector<16x32xbf16>
    %c0_1 = arith.constant 0 : index
    %c0_2 = arith.constant 0 : index
    %2 = vector.load %arg2[%c0_1, %c0_2] : memref<32x64xbf16, #tpu.memory_space<vmem>>, vector<32x64xbf16>
    %cst = arith.constant dense<0.000000e+00> : vector<16x64xf32>
    %3 = tpu.matmul %1, %2, %cst {dimension_numbers = #tpu.dot_dimension_numbers<[1], [0], [0], [1], [0, 0, 1, 1], [], []>} : vector<16x32xbf16>, vector<32x64xbf16>, vector<16x64xf32> -> vector<16x64xf32>
    %c0_3 = arith.constant 0 : index
    %c0_4 = arith.constant 0 : index
    %4 = vector.load %arg3[%c0_3, %c0_4] : memref<1x64xf32, #tpu.memory_space<vmem>>, vector<1x64xf32>
    %5 = vector.broadcast %4 : vector<1x64xf32> to vector<16x64xf32>
    %6 = arith.addf %3, %5 : vector<16x64xf32>
    %7 = tpu.iota {dimensions = array<i32: 0>} : vector<16x16xi32>
    %8 = tpu.iota {dimensions = array<i32: 1>} : vector<16x16xi32>
    %c2_i32 = arith.constant 2 : i32
    %c0_i32 = arith.constant 0 : i32
    %9 = arith.cmpi eq, %c2_i32, %c0_i32 : i32
    %c1_i32 = arith.constant 1 : i32
    %10 = arith.select %9, %c1_i32, %c2_i32 : i32
    %11 = vector.broadcast %10 : i32 to vector<16x16xi32>
    %12 = arith.remsi %7, %11 : vector<16x16xi32>
    %c0_i32_5 = arith.constant 0 : i32
    %13 = vector.broadcast %c0_i32_5 : i32 to vector<16x16xi32>
    %14 = arith.cmpi ne, %12, %13 : vector<16x16xi32>
    %c0_i32_6 = arith.constant 0 : i32
    %15 = vector.broadcast %c0_i32_6 : i32 to vector<16x16xi32>
    %16 = arith.cmpi slt, %12, %15 : vector<16x16xi32>
    %c0_i32_7 = arith.constant 0 : i32
    %17 = arith.cmpi slt, %10, %c0_i32_7 : i32
    %18 = vector.broadcast %17 : i1 to vector<16x16xi1>
    %19 = vector.broadcast %18 : vector<16x16xi1> to vector<16x16xi1>
    %20 = arith.xori %16, %19 : vector<16x16xi1>
    %21 = arith.andi %20, %14 : vector<16x16xi1>
    %22 = vector.broadcast %10 : i32 to vector<16x16xi32>
    %23 = arith.addi %12, %22 : vector<16x16xi32>
    %24 = arith.select %21, %23, %12 : vector<16x16xi1>, vector<16x16xi32>
    %c2_i32_8 = arith.constant 2 : i32
    %c0_i32_9 = arith.constant 0 : i32
    %25 = arith.cmpi eq, %c2_i32_8, %c0_i32_9 : i32
    %c1_i32_10 = arith.constant 1 : i32
    %26 = arith.select %25, %c1_i32_10, %c2_i32_8 : i32
    %27 = vector.broadcast %26 : i32 to vector<16x16xi32>
    %28 = arith.remsi %8, %27 : vector<16x16xi32>
    %c0_i32_11 = arith.constant 0 : i32
    %29 = vector.broadcast %c0_i32_11 : i32 to vector<16x16xi32>
    %30 = arith.cmpi ne, %28, %29 : vector<16x16xi32>
    %c0_i32_12 = arith.constant 0 : i32
    %31 = vector.broadcast %c0_i32_12 : i32 to vector<16x16xi32>
    %32 = arith.cmpi slt, %28, %31 : vector<16x16xi32>
    %c0_i32_13 = arith.constant 0 : i32
    %33 = arith.cmpi slt, %26, %c0_i32_13 : i32
    %34 = vector.broadcast %33 : i1 to vector<16x16xi1>
    %35 = vector.broadcast %34 : vector<16x16xi1> to vector<16x16xi1>
    %36 = arith.xori %32, %35 : vector<16x16xi1>
    %37 = arith.andi %36, %30 : vector<16x16xi1>
    %38 = vector.broadcast %26 : i32 to vector<16x16xi32>
    %39 = arith.addi %28, %38 : vector<16x16xi32>
    %40 = arith.select %37, %39, %28 : vector<16x16xi1>, vector<16x16xi32>
    %41 = arith.cmpi eq, %24, %40 : vector<16x16xi32>
    %cst_14 = arith.constant 0.000000e+00 : f32
    %cst_15 = arith.constant -1.000000e+30 : f32
    %42 = vector.broadcast %cst_14 : f32 to vector<16x16xf32>
    %43 = vector.broadcast %cst_15 : f32 to vector<16x16xf32>
    %44 = arith.select %41, %42, %43 : vector<16x16xi1>, vector<16x16xf32>
    %c0_16 = arith.constant 0 : index
    %c0_17 = arith.constant 0 : index
    %45 = vector.load %arg1[%c0_16, %c0_17] : memref<1x16xf32, #tpu.memory_space<vmem>>, vector<1x16xf32>
    %cst_18 = arith.constant -1.000000e+30 : f32
    %46 = vector.broadcast %cst_18 : f32 to vector<1x16xf32>
    %47 = arith.mulf %45, %46 : vector<1x16xf32>
    %48 = vector.broadcast %47 : vector<1x16xf32> to vector<16x16xf32>
    %49 = arith.addf %44, %48 : vector<16x16xf32>
    %50 = tpu.iota {dimensions = array<i32: 1>} : vector<1x64xi32>
    %c0_i32_19 = arith.constant 0 : i32
    %51 = vector.broadcast %c0_i32_19 : i32 to vector<1x64xi32>
    %52 = arith.cmpi sge, %50, %51 : vector<1x64xi32>
    %c16_i32 = arith.constant 16 : i32
    %53 = vector.broadcast %c16_i32 : i32 to vector<1x64xi32>
    %54 = arith.cmpi slt, %50, %53 : vector<1x64xi32>
    %55 = arith.andi %52, %54 : vector<1x64xi1>
    %56 = arith.extui %55 : vector<1x64xi1> to vector<1x64xi32>
    %57 = arith.sitofp %56 : vector<1x64xi32> to vector<1x64xf32>
    %c16_i32_20 = arith.constant 16 : i32
    %58 = vector.broadcast %c16_i32_20 : i32 to vector<1x64xi32>
    %59 = arith.cmpi sge, %50, %58 : vector<1x64xi32>
    %c32_i32 = arith.constant 32 : i32
    %60 = vector.broadcast %c32_i32 : i32 to vector<1x64xi32>
    %61 = arith.cmpi slt, %50, %60 : vector<1x64xi32>
    %62 = arith.andi %59, %61 : vector<1x64xi1>
    %63 = arith.extui %62 : vector<1x64xi1> to vector<1x64xi32>
    %64 = arith.sitofp %63 : vector<1x64xi32> to vector<1x64xf32>
    %c32_i32_21 = arith.constant 32 : i32
    %65 = vector.broadcast %c32_i32_21 : i32 to vector<1x64xi32>
    %66 = arith.cmpi sge, %50, %65 : vector<1x64xi32>
    %c48_i32 = arith.constant 48 : i32
    %67 = vector.broadcast %c48_i32 : i32 to vector<1x64xi32>
    %68 = arith.cmpi slt, %50, %67 : vector<1x64xi32>
    %69 = arith.andi %66, %68 : vector<1x64xi1>
    %70 = arith.extui %69 : vector<1x64xi1> to vector<1x64xi32>
    %71 = arith.sitofp %70 : vector<1x64xi32> to vector<1x64xf32>
    %c48_i32_22 = arith.constant 48 : i32
    %72 = vector.broadcast %c48_i32_22 : i32 to vector<1x64xi32>
    %73 = arith.cmpi sge, %50, %72 : vector<1x64xi32>
    %c64_i32 = arith.constant 64 : i32
    %74 = vector.broadcast %c64_i32 : i32 to vector<1x64xi32>
    %75 = arith.cmpi slt, %50, %74 : vector<1x64xi32>
    %76 = arith.andi %73, %75 : vector<1x64xi1>
    %77 = arith.extui %76 : vector<1x64xi1> to vector<1x64xi32>
    %78 = arith.sitofp %77 : vector<1x64xi32> to vector<1x64xf32>
    %79 = arith.truncf %6 : vector<16x64xf32> to vector<16x64xbf16>
    %c0_23 = arith.constant 0 : index
    %c0_24 = arith.constant 0 : index
    %c0_25 = arith.constant 0 : index
    %80 = vector.load %arg4[%c0_23, %c0_24, %c0_25] : memref<2x64x192xbf16, #tpu.memory_space<vmem>>, vector<1x64x192xbf16>
    %81 = vector.shape_cast %80 : vector<1x64x192xbf16> to vector<64x192xbf16>
    %cst_26 = arith.constant dense<0.000000e+00> : vector<16x192xf32>
    %82 = tpu.matmul %79, %81, %cst_26 {dimension_numbers = #tpu.dot_dimension_numbers<[1], [0], [0], [1], [0, 0, 1, 1], [], []>} : vector<16x64xbf16>, vector<64x192xbf16>, vector<16x192xf32> -> vector<16x192xf32>
    %c0_27 = arith.constant 0 : index
    %c0_28 = arith.constant 0 : index
    %c0_29 = arith.constant 0 : index
    %83 = vector.load %arg5[%c0_27, %c0_28, %c0_29] : memref<2x1x192xf32, #tpu.memory_space<vmem>>, vector<1x1x192xf32>
    %84 = vector.shape_cast %83 : vector<1x1x192xf32> to vector<1x192xf32>
    %85 = vector.broadcast %84 : vector<1x192xf32> to vector<16x192xf32>
    %86 = arith.addf %82, %85 : vector<16x192xf32>
    %87 = vector.extract_strided_slice %86 {offsets = [0, 0], sizes = [16, 64], strides = [1, 1]} : vector<16x192xf32> to vector<16x64xf32>
    %88 = vector.extract_strided_slice %86 {offsets = [0, 64], sizes = [16, 64], strides = [1, 1]} : vector<16x192xf32> to vector<16x64xf32>
    %89 = arith.truncf %88 : vector<16x64xf32> to vector<16x64xbf16>
    %90 = vector.extract_strided_slice %86 {offsets = [0, 128], sizes = [16, 64], strides = [1, 1]} : vector<16x192xf32> to vector<16x64xf32>
    %91 = vector.broadcast %57 : vector<1x64xf32> to vector<16x64xf32>
    %92 = arith.mulf %87, %91 : vector<16x64xf32>
    %93 = arith.truncf %92 : vector<16x64xf32> to vector<16x64xbf16>
    %cst_30 = arith.constant dense<0.000000e+00> : vector<16x16xf32>
    %94 = tpu.matmul %93, %89, %cst_30 {dimension_numbers = #tpu.dot_dimension_numbers<[1], [1], [0], [0], [0, 0, 1, 0], [], []>} : vector<16x64xbf16>, vector<16x64xbf16>, vector<16x16xf32> -> vector<16x16xf32>
    %95 = arith.addf %94, %49 : vector<16x16xf32>
    %cst_31 = arith.constant dense<0xFF800000> : vector<16xf32>
    %96 = vector.multi_reduction <maximumf>, %95, %cst_31 [1] : vector<16x16xf32> to vector<16xf32>
    %97 = vector.shape_cast %96 : vector<16xf32> to vector<16x1xf32>
    %98 = vector.broadcast %97 : vector<16x1xf32> to vector<16x16xf32>
    %99 = arith.subf %95, %98 : vector<16x16xf32>
    %100 = math.exp %99 : vector<16x16xf32>
    %cst_32 = arith.constant dense<0.000000e+00> : vector<16xf32>
    %101 = vector.multi_reduction <add>, %100, %cst_32 [1] : vector<16x16xf32> to vector<16xf32>
    %102 = vector.shape_cast %101 : vector<16xf32> to vector<16x1xf32>
    %103 = vector.broadcast %102 : vector<16x1xf32> to vector<16x16xf32>
    %104 = arith.divf %100, %103 : vector<16x16xf32>
    %105 = arith.truncf %104 : vector<16x16xf32> to vector<16x16xbf16>
    %106 = vector.broadcast %57 : vector<1x64xf32> to vector<16x64xf32>
    %107 = arith.mulf %90, %106 : vector<16x64xf32>
    %108 = arith.truncf %107 : vector<16x64xf32> to vector<16x64xbf16>
    %109 = vector.broadcast %64 : vector<1x64xf32> to vector<16x64xf32>
    %110 = arith.mulf %87, %109 : vector<16x64xf32>
    %111 = arith.truncf %110 : vector<16x64xf32> to vector<16x64xbf16>
    %cst_33 = arith.constant dense<0.000000e+00> : vector<16x16xf32>
    %112 = tpu.matmul %111, %89, %cst_33 {dimension_numbers = #tpu.dot_dimension_numbers<[1], [1], [0], [0], [0, 0, 1, 0], [], []>} : vector<16x64xbf16>, vector<16x64xbf16>, vector<16x16xf32> -> vector<16x16xf32>
    %113 = arith.addf %112, %49 : vector<16x16xf32>
    %cst_34 = arith.constant dense<0xFF800000> : vector<16xf32>
    %114 = vector.multi_reduction <maximumf>, %113, %cst_34 [1] : vector<16x16xf32> to vector<16xf32>
    %115 = vector.shape_cast %114 : vector<16xf32> to vector<16x1xf32>
    %116 = vector.broadcast %115 : vector<16x1xf32> to vector<16x16xf32>
    %117 = arith.subf %113, %116 : vector<16x16xf32>
    %118 = math.exp %117 : vector<16x16xf32>
    %cst_35 = arith.constant dense<0.000000e+00> : vector<16xf32>
    %119 = vector.multi_reduction <add>, %118, %cst_35 [1] : vector<16x16xf32> to vector<16xf32>
    %120 = vector.shape_cast %119 : vector<16xf32> to vector<16x1xf32>
    %121 = vector.broadcast %120 : vector<16x1xf32> to vector<16x16xf32>
    %122 = arith.divf %118, %121 : vector<16x16xf32>
    %123 = arith.truncf %122 : vector<16x16xf32> to vector<16x16xbf16>
    %124 = vector.broadcast %64 : vector<1x64xf32> to vector<16x64xf32>
    %125 = arith.mulf %90, %124 : vector<16x64xf32>
    %126 = arith.truncf %125 : vector<16x64xf32> to vector<16x64xbf16>
    %127 = vector.broadcast %71 : vector<1x64xf32> to vector<16x64xf32>
    %128 = arith.mulf %87, %127 : vector<16x64xf32>
    %129 = arith.truncf %128 : vector<16x64xf32> to vector<16x64xbf16>
    %cst_36 = arith.constant dense<0.000000e+00> : vector<16x16xf32>
    %130 = tpu.matmul %129, %89, %cst_36 {dimension_numbers = #tpu.dot_dimension_numbers<[1], [1], [0], [0], [0, 0, 1, 0], [], []>} : vector<16x64xbf16>, vector<16x64xbf16>, vector<16x16xf32> -> vector<16x16xf32>
    %131 = arith.addf %130, %49 : vector<16x16xf32>
    %cst_37 = arith.constant dense<0xFF800000> : vector<16xf32>
    %132 = vector.multi_reduction <maximumf>, %131, %cst_37 [1] : vector<16x16xf32> to vector<16xf32>
    %133 = vector.shape_cast %132 : vector<16xf32> to vector<16x1xf32>
    %134 = vector.broadcast %133 : vector<16x1xf32> to vector<16x16xf32>
    %135 = arith.subf %131, %134 : vector<16x16xf32>
    %136 = math.exp %135 : vector<16x16xf32>
    %cst_38 = arith.constant dense<0.000000e+00> : vector<16xf32>
    %137 = vector.multi_reduction <add>, %136, %cst_38 [1] : vector<16x16xf32> to vector<16xf32>
    %138 = vector.shape_cast %137 : vector<16xf32> to vector<16x1xf32>
    %139 = vector.broadcast %138 : vector<16x1xf32> to vector<16x16xf32>
    %140 = arith.divf %136, %139 : vector<16x16xf32>
    %141 = arith.truncf %140 : vector<16x16xf32> to vector<16x16xbf16>
    %142 = vector.broadcast %71 : vector<1x64xf32> to vector<16x64xf32>
    %143 = arith.mulf %90, %142 : vector<16x64xf32>
    %144 = arith.truncf %143 : vector<16x64xf32> to vector<16x64xbf16>
    %145 = vector.broadcast %78 : vector<1x64xf32> to vector<16x64xf32>
    %146 = arith.mulf %87, %145 : vector<16x64xf32>
    %147 = arith.truncf %146 : vector<16x64xf32> to vector<16x64xbf16>
    %cst_39 = arith.constant dense<0.000000e+00> : vector<16x16xf32>
    %148 = tpu.matmul %147, %89, %cst_39 {dimension_numbers = #tpu.dot_dimension_numbers<[1], [1], [0], [0], [0, 0, 1, 0], [], []>} : vector<16x64xbf16>, vector<16x64xbf16>, vector<16x16xf32> -> vector<16x16xf32>
    %149 = arith.addf %148, %49 : vector<16x16xf32>
    %cst_40 = arith.constant dense<0xFF800000> : vector<16xf32>
    %150 = vector.multi_reduction <maximumf>, %149, %cst_40 [1] : vector<16x16xf32> to vector<16xf32>
    %151 = vector.shape_cast %150 : vector<16xf32> to vector<16x1xf32>
    %152 = vector.broadcast %151 : vector<16x1xf32> to vector<16x16xf32>
    %153 = arith.subf %149, %152 : vector<16x16xf32>
    %154 = math.exp %153 : vector<16x16xf32>
    %cst_41 = arith.constant dense<0.000000e+00> : vector<16xf32>
    %155 = vector.multi_reduction <add>, %154, %cst_41 [1] : vector<16x16xf32> to vector<16xf32>
    %156 = vector.shape_cast %155 : vector<16xf32> to vector<16x1xf32>
    %157 = vector.broadcast %156 : vector<16x1xf32> to vector<16x16xf32>
    %158 = arith.divf %154, %157 : vector<16x16xf32>
    %159 = arith.truncf %158 : vector<16x16xf32> to vector<16x16xbf16>
    %160 = vector.broadcast %78 : vector<1x64xf32> to vector<16x64xf32>
    %161 = arith.mulf %90, %160 : vector<16x64xf32>
    %162 = arith.truncf %161 : vector<16x64xf32> to vector<16x64xbf16>
    %163 = tpu.concatenate %105, %123, %141, %159 in 1 : vector<16x16xbf16>, vector<16x16xbf16>, vector<16x16xbf16>, vector<16x16xbf16> -> vector<16x64xbf16>
    %164 = tpu.concatenate %108, %126, %144, %162 in 0 : vector<16x64xbf16>, vector<16x64xbf16>, vector<16x64xbf16>, vector<16x64xbf16> -> vector<64x64xbf16>
    %cst_42 = arith.constant dense<0.000000e+00> : vector<16x64xf32>
    %165 = tpu.matmul %163, %164, %cst_42 {dimension_numbers = #tpu.dot_dimension_numbers<[1], [0], [0], [1], [0, 0, 1, 1], [], []>} : vector<16x64xbf16>, vector<64x64xbf16>, vector<16x64xf32> -> vector<16x64xf32>
    %166 = arith.truncf %165 : vector<16x64xf32> to vector<16x64xbf16>
    %c0_43 = arith.constant 0 : index
    %c0_44 = arith.constant 0 : index
    %c0_45 = arith.constant 0 : index
    %167 = vector.load %arg6[%c0_43, %c0_44, %c0_45] : memref<2x64x64xbf16, #tpu.memory_space<vmem>>, vector<1x64x64xbf16>
    %168 = vector.shape_cast %167 : vector<1x64x64xbf16> to vector<64x64xbf16>
    %cst_46 = arith.constant dense<0.000000e+00> : vector<16x64xf32>
    %169 = tpu.matmul %166, %168, %cst_46 {dimension_numbers = #tpu.dot_dimension_numbers<[1], [0], [0], [1], [0, 0, 1, 1], [], []>} : vector<16x64xbf16>, vector<64x64xbf16>, vector<16x64xf32> -> vector<16x64xf32>
    %c0_47 = arith.constant 0 : index
    %c0_48 = arith.constant 0 : index
    %c0_49 = arith.constant 0 : index
    %170 = vector.load %arg7[%c0_47, %c0_48, %c0_49] : memref<2x1x64xf32, #tpu.memory_space<vmem>>, vector<1x1x64xf32>
    %171 = vector.shape_cast %170 : vector<1x1x64xf32> to vector<1x64xf32>
    %172 = vector.broadcast %171 : vector<1x64xf32> to vector<16x64xf32>
    %173 = arith.addf %169, %172 : vector<16x64xf32>
    %174 = arith.addf %173, %6 : vector<16x64xf32>
    %c0_50 = arith.constant 0 : index
    %c0_51 = arith.constant 0 : index
    %c0_52 = arith.constant 0 : index
    %175 = vector.load %arg8[%c0_50, %c0_51, %c0_52] : memref<2x1x64xf32, #tpu.memory_space<vmem>>, vector<1x1x64xf32>
    %176 = vector.shape_cast %175 : vector<1x1x64xf32> to vector<1x64xf32>
    %c0_53 = arith.constant 0 : index
    %c0_54 = arith.constant 0 : index
    %c0_55 = arith.constant 0 : index
    %177 = vector.load %arg9[%c0_53, %c0_54, %c0_55] : memref<2x1x64xf32, #tpu.memory_space<vmem>>, vector<1x1x64xf32>
    %178 = vector.shape_cast %177 : vector<1x1x64xf32> to vector<1x64xf32>
    %cst_56 = arith.constant dense<0.000000e+00> : vector<16xf32>
    %179 = vector.multi_reduction <add>, %174, %cst_56 [1] : vector<16x64xf32> to vector<16xf32>
    %180 = vector.shape_cast %179 : vector<16xf32> to vector<16x1xf32>
    %cst_57 = arith.constant 6.400000e+01 : f32
    %181 = vector.broadcast %cst_57 : f32 to vector<16x1xf32>
    %182 = arith.divf %180, %181 : vector<16x1xf32>
    %183 = vector.broadcast %182 : vector<16x1xf32> to vector<16x64xf32>
    %184 = arith.subf %174, %183 : vector<16x64xf32>
    %185 = arith.mulf %184, %184 : vector<16x64xf32>
    %cst_58 = arith.constant dense<0.000000e+00> : vector<16xf32>
    %186 = vector.multi_reduction <add>, %185, %cst_58 [1] : vector<16x64xf32> to vector<16xf32>
    %187 = vector.shape_cast %186 : vector<16xf32> to vector<16x1xf32>
    %cst_59 = arith.constant 6.400000e+01 : f32
    %188 = vector.broadcast %cst_59 : f32 to vector<16x1xf32>
    %189 = arith.divf %187, %188 : vector<16x1xf32>
    %190 = vector.broadcast %182 : vector<16x1xf32> to vector<16x64xf32>
    %191 = arith.subf %174, %190 : vector<16x64xf32>
    %cst_60 = arith.constant 9.99999974E-6 : f32
    %192 = vector.broadcast %cst_60 : f32 to vector<16x1xf32>
    %193 = arith.addf %189, %192 : vector<16x1xf32>
    %194 = math.rsqrt %193 : vector<16x1xf32>
    %195 = vector.broadcast %194 : vector<16x1xf32> to vector<16x64xf32>
    %196 = arith.mulf %191, %195 : vector<16x64xf32>
    %197 = vector.broadcast %176 : vector<1x64xf32> to vector<16x64xf32>
    %198 = arith.mulf %196, %197 : vector<16x64xf32>
    %199 = vector.broadcast %178 : vector<1x64xf32> to vector<16x64xf32>
    %200 = arith.addf %198, %199 : vector<16x64xf32>
    %201 = arith.truncf %200 : vector<16x64xf32> to vector<16x64xbf16>
    %c0_61 = arith.constant 0 : index
    %c0_62 = arith.constant 0 : index
    %c0_63 = arith.constant 0 : index
    %202 = vector.load %arg10[%c0_61, %c0_62, %c0_63] : memref<2x64x128xbf16, #tpu.memory_space<vmem>>, vector<1x64x128xbf16>
    %203 = vector.shape_cast %202 : vector<1x64x128xbf16> to vector<64x128xbf16>
    %cst_64 = arith.constant dense<0.000000e+00> : vector<16x128xf32>
    %204 = tpu.matmul %201, %203, %cst_64 {dimension_numbers = #tpu.dot_dimension_numbers<[1], [0], [0], [1], [0, 0, 1, 1], [], []>} : vector<16x64xbf16>, vector<64x128xbf16>, vector<16x128xf32> -> vector<16x128xf32>
    %c0_65 = arith.constant 0 : index
    %c0_66 = arith.constant 0 : index
    %c0_67 = arith.constant 0 : index
    %205 = vector.load %arg11[%c0_65, %c0_66, %c0_67] : memref<2x1x128xf32, #tpu.memory_space<vmem>>, vector<1x1x128xf32>
    %206 = vector.shape_cast %205 : vector<1x1x128xf32> to vector<1x128xf32>
    %207 = vector.broadcast %206 : vector<1x128xf32> to vector<16x128xf32>
    %208 = arith.addf %204, %207 : vector<16x128xf32>
    %cst_68 = arith.constant 0.000000e+00 : f32
    %209 = vector.broadcast %cst_68 : f32 to vector<16x128xf32>
    %210 = arith.maximumf %208, %209 : vector<16x128xf32>
    %211 = arith.truncf %210 : vector<16x128xf32> to vector<16x128xbf16>
    %c0_69 = arith.constant 0 : index
    %c0_70 = arith.constant 0 : index
    %c0_71 = arith.constant 0 : index
    %212 = vector.load %arg12[%c0_69, %c0_70, %c0_71] : memref<2x128x64xbf16, #tpu.memory_space<vmem>>, vector<1x128x64xbf16>
    %213 = vector.shape_cast %212 : vector<1x128x64xbf16> to vector<128x64xbf16>
    %cst_72 = arith.constant dense<0.000000e+00> : vector<16x64xf32>
    %214 = tpu.matmul %211, %213, %cst_72 {dimension_numbers = #tpu.dot_dimension_numbers<[1], [0], [0], [1], [0, 0, 1, 1], [], []>} : vector<16x128xbf16>, vector<128x64xbf16>, vector<16x64xf32> -> vector<16x64xf32>
    %c0_73 = arith.constant 0 : index
    %c0_74 = arith.constant 0 : index
    %c0_75 = arith.constant 0 : index
    %215 = vector.load %arg13[%c0_73, %c0_74, %c0_75] : memref<2x1x64xf32, #tpu.memory_space<vmem>>, vector<1x1x64xf32>
    %216 = vector.shape_cast %215 : vector<1x1x64xf32> to vector<1x64xf32>
    %217 = vector.broadcast %216 : vector<1x64xf32> to vector<16x64xf32>
    %218 = arith.addf %214, %217 : vector<16x64xf32>
    %219 = arith.addf %218, %200 : vector<16x64xf32>
    %c0_76 = arith.constant 0 : index
    %c0_77 = arith.constant 0 : index
    %c0_78 = arith.constant 0 : index
    %220 = vector.load %arg14[%c0_76, %c0_77, %c0_78] : memref<2x1x64xf32, #tpu.memory_space<vmem>>, vector<1x1x64xf32>
    %221 = vector.shape_cast %220 : vector<1x1x64xf32> to vector<1x64xf32>
    %c0_79 = arith.constant 0 : index
    %c0_80 = arith.constant 0 : index
    %c0_81 = arith.constant 0 : index
    %222 = vector.load %arg15[%c0_79, %c0_80, %c0_81] : memref<2x1x64xf32, #tpu.memory_space<vmem>>, vector<1x1x64xf32>
    %223 = vector.shape_cast %222 : vector<1x1x64xf32> to vector<1x64xf32>
    %cst_82 = arith.constant dense<0.000000e+00> : vector<16xf32>
    %224 = vector.multi_reduction <add>, %219, %cst_82 [1] : vector<16x64xf32> to vector<16xf32>
    %225 = vector.shape_cast %224 : vector<16xf32> to vector<16x1xf32>
    %cst_83 = arith.constant 6.400000e+01 : f32
    %226 = vector.broadcast %cst_83 : f32 to vector<16x1xf32>
    %227 = arith.divf %225, %226 : vector<16x1xf32>
    %228 = vector.broadcast %227 : vector<16x1xf32> to vector<16x64xf32>
    %229 = arith.subf %219, %228 : vector<16x64xf32>
    %230 = arith.mulf %229, %229 : vector<16x64xf32>
    %cst_84 = arith.constant dense<0.000000e+00> : vector<16xf32>
    %231 = vector.multi_reduction <add>, %230, %cst_84 [1] : vector<16x64xf32> to vector<16xf32>
    %232 = vector.shape_cast %231 : vector<16xf32> to vector<16x1xf32>
    %cst_85 = arith.constant 6.400000e+01 : f32
    %233 = vector.broadcast %cst_85 : f32 to vector<16x1xf32>
    %234 = arith.divf %232, %233 : vector<16x1xf32>
    %235 = vector.broadcast %227 : vector<16x1xf32> to vector<16x64xf32>
    %236 = arith.subf %219, %235 : vector<16x64xf32>
    %cst_86 = arith.constant 9.99999974E-6 : f32
    %237 = vector.broadcast %cst_86 : f32 to vector<16x1xf32>
    %238 = arith.addf %234, %237 : vector<16x1xf32>
    %239 = math.rsqrt %238 : vector<16x1xf32>
    %240 = vector.broadcast %239 : vector<16x1xf32> to vector<16x64xf32>
    %241 = arith.mulf %236, %240 : vector<16x64xf32>
    %242 = vector.broadcast %221 : vector<1x64xf32> to vector<16x64xf32>
    %243 = arith.mulf %241, %242 : vector<16x64xf32>
    %244 = vector.broadcast %223 : vector<1x64xf32> to vector<16x64xf32>
    %245 = arith.addf %243, %244 : vector<16x64xf32>
    %246 = arith.truncf %245 : vector<16x64xf32> to vector<16x64xbf16>
    %c1 = arith.constant 1 : index
    %c0_87 = arith.constant 0 : index
    %c0_88 = arith.constant 0 : index
    %247 = vector.load %arg4[%c1, %c0_87, %c0_88] : memref<2x64x192xbf16, #tpu.memory_space<vmem>>, vector<1x64x192xbf16>
    %248 = vector.shape_cast %247 : vector<1x64x192xbf16> to vector<64x192xbf16>
    %cst_89 = arith.constant dense<0.000000e+00> : vector<16x192xf32>
    %249 = tpu.matmul %246, %248, %cst_89 {dimension_numbers = #tpu.dot_dimension_numbers<[1], [0], [0], [1], [0, 0, 1, 1], [], []>} : vector<16x64xbf16>, vector<64x192xbf16>, vector<16x192xf32> -> vector<16x192xf32>
    %c1_90 = arith.constant 1 : index
    %c0_91 = arith.constant 0 : index
    %c0_92 = arith.constant 0 : index
    %250 = vector.load %arg5[%c1_90, %c0_91, %c0_92] : memref<2x1x192xf32, #tpu.memory_space<vmem>>, vector<1x1x192xf32>
    %251 = vector.shape_cast %250 : vector<1x1x192xf32> to vector<1x192xf32>
    %252 = vector.broadcast %251 : vector<1x192xf32> to vector<16x192xf32>
    %253 = arith.addf %249, %252 : vector<16x192xf32>
    %254 = vector.extract_strided_slice %253 {offsets = [0, 0], sizes = [16, 64], strides = [1, 1]} : vector<16x192xf32> to vector<16x64xf32>
    %255 = vector.extract_strided_slice %253 {offsets = [0, 64], sizes = [16, 64], strides = [1, 1]} : vector<16x192xf32> to vector<16x64xf32>
    %256 = arith.truncf %255 : vector<16x64xf32> to vector<16x64xbf16>
    %257 = vector.extract_strided_slice %253 {offsets = [0, 128], sizes = [16, 64], strides = [1, 1]} : vector<16x192xf32> to vector<16x64xf32>
    %258 = vector.broadcast %57 : vector<1x64xf32> to vector<16x64xf32>
    %259 = arith.mulf %254, %258 : vector<16x64xf32>
    %260 = arith.truncf %259 : vector<16x64xf32> to vector<16x64xbf16>
    %cst_93 = arith.constant dense<0.000000e+00> : vector<16x16xf32>
    %261 = tpu.matmul %260, %256, %cst_93 {dimension_numbers = #tpu.dot_dimension_numbers<[1], [1], [0], [0], [0, 0, 1, 0], [], []>} : vector<16x64xbf16>, vector<16x64xbf16>, vector<16x16xf32> -> vector<16x16xf32>
    %262 = arith.addf %261, %49 : vector<16x16xf32>
    %cst_94 = arith.constant dense<0xFF800000> : vector<16xf32>
    %263 = vector.multi_reduction <maximumf>, %262, %cst_94 [1] : vector<16x16xf32> to vector<16xf32>
    %264 = vector.shape_cast %263 : vector<16xf32> to vector<16x1xf32>
    %265 = vector.broadcast %264 : vector<16x1xf32> to vector<16x16xf32>
    %266 = arith.subf %262, %265 : vector<16x16xf32>
    %267 = math.exp %266 : vector<16x16xf32>
    %cst_95 = arith.constant dense<0.000000e+00> : vector<16xf32>
    %268 = vector.multi_reduction <add>, %267, %cst_95 [1] : vector<16x16xf32> to vector<16xf32>
    %269 = vector.shape_cast %268 : vector<16xf32> to vector<16x1xf32>
    %270 = vector.broadcast %269 : vector<16x1xf32> to vector<16x16xf32>
    %271 = arith.divf %267, %270 : vector<16x16xf32>
    %272 = arith.truncf %271 : vector<16x16xf32> to vector<16x16xbf16>
    %273 = vector.broadcast %57 : vector<1x64xf32> to vector<16x64xf32>
    %274 = arith.mulf %257, %273 : vector<16x64xf32>
    %275 = arith.truncf %274 : vector<16x64xf32> to vector<16x64xbf16>
    %276 = vector.broadcast %64 : vector<1x64xf32> to vector<16x64xf32>
    %277 = arith.mulf %254, %276 : vector<16x64xf32>
    %278 = arith.truncf %277 : vector<16x64xf32> to vector<16x64xbf16>
    %cst_96 = arith.constant dense<0.000000e+00> : vector<16x16xf32>
    %279 = tpu.matmul %278, %256, %cst_96 {dimension_numbers = #tpu.dot_dimension_numbers<[1], [1], [0], [0], [0, 0, 1, 0], [], []>} : vector<16x64xbf16>, vector<16x64xbf16>, vector<16x16xf32> -> vector<16x16xf32>
    %280 = arith.addf %279, %49 : vector<16x16xf32>
    %cst_97 = arith.constant dense<0xFF800000> : vector<16xf32>
    %281 = vector.multi_reduction <maximumf>, %280, %cst_97 [1] : vector<16x16xf32> to vector<16xf32>
    %282 = vector.shape_cast %281 : vector<16xf32> to vector<16x1xf32>
    %283 = vector.broadcast %282 : vector<16x1xf32> to vector<16x16xf32>
    %284 = arith.subf %280, %283 : vector<16x16xf32>
    %285 = math.exp %284 : vector<16x16xf32>
    %cst_98 = arith.constant dense<0.000000e+00> : vector<16xf32>
    %286 = vector.multi_reduction <add>, %285, %cst_98 [1] : vector<16x16xf32> to vector<16xf32>
    %287 = vector.shape_cast %286 : vector<16xf32> to vector<16x1xf32>
    %288 = vector.broadcast %287 : vector<16x1xf32> to vector<16x16xf32>
    %289 = arith.divf %285, %288 : vector<16x16xf32>
    %290 = arith.truncf %289 : vector<16x16xf32> to vector<16x16xbf16>
    %291 = vector.broadcast %64 : vector<1x64xf32> to vector<16x64xf32>
    %292 = arith.mulf %257, %291 : vector<16x64xf32>
    %293 = arith.truncf %292 : vector<16x64xf32> to vector<16x64xbf16>
    %294 = vector.broadcast %71 : vector<1x64xf32> to vector<16x64xf32>
    %295 = arith.mulf %254, %294 : vector<16x64xf32>
    %296 = arith.truncf %295 : vector<16x64xf32> to vector<16x64xbf16>
    %cst_99 = arith.constant dense<0.000000e+00> : vector<16x16xf32>
    %297 = tpu.matmul %296, %256, %cst_99 {dimension_numbers = #tpu.dot_dimension_numbers<[1], [1], [0], [0], [0, 0, 1, 0], [], []>} : vector<16x64xbf16>, vector<16x64xbf16>, vector<16x16xf32> -> vector<16x16xf32>
    %298 = arith.addf %297, %49 : vector<16x16xf32>
    %cst_100 = arith.constant dense<0xFF800000> : vector<16xf32>
    %299 = vector.multi_reduction <maximumf>, %298, %cst_100 [1] : vector<16x16xf32> to vector<16xf32>
    %300 = vector.shape_cast %299 : vector<16xf32> to vector<16x1xf32>
    %301 = vector.broadcast %300 : vector<16x1xf32> to vector<16x16xf32>
    %302 = arith.subf %298, %301 : vector<16x16xf32>
    %303 = math.exp %302 : vector<16x16xf32>
    %cst_101 = arith.constant dense<0.000000e+00> : vector<16xf32>
    %304 = vector.multi_reduction <add>, %303, %cst_101 [1] : vector<16x16xf32> to vector<16xf32>
    %305 = vector.shape_cast %304 : vector<16xf32> to vector<16x1xf32>
    %306 = vector.broadcast %305 : vector<16x1xf32> to vector<16x16xf32>
    %307 = arith.divf %303, %306 : vector<16x16xf32>
    %308 = arith.truncf %307 : vector<16x16xf32> to vector<16x16xbf16>
    %309 = vector.broadcast %71 : vector<1x64xf32> to vector<16x64xf32>
    %310 = arith.mulf %257, %309 : vector<16x64xf32>
    %311 = arith.truncf %310 : vector<16x64xf32> to vector<16x64xbf16>
    %312 = vector.broadcast %78 : vector<1x64xf32> to vector<16x64xf32>
    %313 = arith.mulf %254, %312 : vector<16x64xf32>
    %314 = arith.truncf %313 : vector<16x64xf32> to vector<16x64xbf16>
    %cst_102 = arith.constant dense<0.000000e+00> : vector<16x16xf32>
    %315 = tpu.matmul %314, %256, %cst_102 {dimension_numbers = #tpu.dot_dimension_numbers<[1], [1], [0], [0], [0, 0, 1, 0], [], []>} : vector<16x64xbf16>, vector<16x64xbf16>, vector<16x16xf32> -> vector<16x16xf32>
    %316 = arith.addf %315, %49 : vector<16x16xf32>
    %cst_103 = arith.constant dense<0xFF800000> : vector<16xf32>
    %317 = vector.multi_reduction <maximumf>, %316, %cst_103 [1] : vector<16x16xf32> to vector<16xf32>
    %318 = vector.shape_cast %317 : vector<16xf32> to vector<16x1xf32>
    %319 = vector.broadcast %318 : vector<16x1xf32> to vector<16x16xf32>
    %320 = arith.subf %316, %319 : vector<16x16xf32>
    %321 = math.exp %320 : vector<16x16xf32>
    %cst_104 = arith.constant dense<0.000000e+00> : vector<16xf32>
    %322 = vector.multi_reduction <add>, %321, %cst_104 [1] : vector<16x16xf32> to vector<16xf32>
    %323 = vector.shape_cast %322 : vector<16xf32> to vector<16x1xf32>
    %324 = vector.broadcast %323 : vector<16x1xf32> to vector<16x16xf32>
    %325 = arith.divf %321, %324 : vector<16x16xf32>
    %326 = arith.truncf %325 : vector<16x16xf32> to vector<16x16xbf16>
    %327 = vector.broadcast %78 : vector<1x64xf32> to vector<16x64xf32>
    %328 = arith.mulf %257, %327 : vector<16x64xf32>
    %329 = arith.truncf %328 : vector<16x64xf32> to vector<16x64xbf16>
    %330 = tpu.concatenate %272, %290, %308, %326 in 1 : vector<16x16xbf16>, vector<16x16xbf16>, vector<16x16xbf16>, vector<16x16xbf16> -> vector<16x64xbf16>
    %331 = tpu.concatenate %275, %293, %311, %329 in 0 : vector<16x64xbf16>, vector<16x64xbf16>, vector<16x64xbf16>, vector<16x64xbf16> -> vector<64x64xbf16>
    %cst_105 = arith.constant dense<0.000000e+00> : vector<16x64xf32>
    %332 = tpu.matmul %330, %331, %cst_105 {dimension_numbers = #tpu.dot_dimension_numbers<[1], [0], [0], [1], [0, 0, 1, 1], [], []>} : vector<16x64xbf16>, vector<64x64xbf16>, vector<16x64xf32> -> vector<16x64xf32>
    %333 = arith.truncf %332 : vector<16x64xf32> to vector<16x64xbf16>
    %c1_106 = arith.constant 1 : index
    %c0_107 = arith.constant 0 : index
    %c0_108 = arith.constant 0 : index
    %334 = vector.load %arg6[%c1_106, %c0_107, %c0_108] : memref<2x64x64xbf16, #tpu.memory_space<vmem>>, vector<1x64x64xbf16>
    %335 = vector.shape_cast %334 : vector<1x64x64xbf16> to vector<64x64xbf16>
    %cst_109 = arith.constant dense<0.000000e+00> : vector<16x64xf32>
    %336 = tpu.matmul %333, %335, %cst_109 {dimension_numbers = #tpu.dot_dimension_numbers<[1], [0], [0], [1], [0, 0, 1, 1], [], []>} : vector<16x64xbf16>, vector<64x64xbf16>, vector<16x64xf32> -> vector<16x64xf32>
    %c1_110 = arith.constant 1 : index
    %c0_111 = arith.constant 0 : index
    %c0_112 = arith.constant 0 : index
    %337 = vector.load %arg7[%c1_110, %c0_111, %c0_112] : memref<2x1x64xf32, #tpu.memory_space<vmem>>, vector<1x1x64xf32>
    %338 = vector.shape_cast %337 : vector<1x1x64xf32> to vector<1x64xf32>
    %339 = vector.broadcast %338 : vector<1x64xf32> to vector<16x64xf32>
    %340 = arith.addf %336, %339 : vector<16x64xf32>
    %341 = arith.addf %340, %245 : vector<16x64xf32>
    %c1_113 = arith.constant 1 : index
    %c0_114 = arith.constant 0 : index
    %c0_115 = arith.constant 0 : index
    %342 = vector.load %arg8[%c1_113, %c0_114, %c0_115] : memref<2x1x64xf32, #tpu.memory_space<vmem>>, vector<1x1x64xf32>
    %343 = vector.shape_cast %342 : vector<1x1x64xf32> to vector<1x64xf32>
    %c1_116 = arith.constant 1 : index
    %c0_117 = arith.constant 0 : index
    %c0_118 = arith.constant 0 : index
    %344 = vector.load %arg9[%c1_116, %c0_117, %c0_118] : memref<2x1x64xf32, #tpu.memory_space<vmem>>, vector<1x1x64xf32>
    %345 = vector.shape_cast %344 : vector<1x1x64xf32> to vector<1x64xf32>
    %cst_119 = arith.constant dense<0.000000e+00> : vector<16xf32>
    %346 = vector.multi_reduction <add>, %341, %cst_119 [1] : vector<16x64xf32> to vector<16xf32>
    %347 = vector.shape_cast %346 : vector<16xf32> to vector<16x1xf32>
    %cst_120 = arith.constant 6.400000e+01 : f32
    %348 = vector.broadcast %cst_120 : f32 to vector<16x1xf32>
    %349 = arith.divf %347, %348 : vector<16x1xf32>
    %350 = vector.broadcast %349 : vector<16x1xf32> to vector<16x64xf32>
    %351 = arith.subf %341, %350 : vector<16x64xf32>
    %352 = arith.mulf %351, %351 : vector<16x64xf32>
    %cst_121 = arith.constant dense<0.000000e+00> : vector<16xf32>
    %353 = vector.multi_reduction <add>, %352, %cst_121 [1] : vector<16x64xf32> to vector<16xf32>
    %354 = vector.shape_cast %353 : vector<16xf32> to vector<16x1xf32>
    %cst_122 = arith.constant 6.400000e+01 : f32
    %355 = vector.broadcast %cst_122 : f32 to vector<16x1xf32>
    %356 = arith.divf %354, %355 : vector<16x1xf32>
    %357 = vector.broadcast %349 : vector<16x1xf32> to vector<16x64xf32>
    %358 = arith.subf %341, %357 : vector<16x64xf32>
    %cst_123 = arith.constant 9.99999974E-6 : f32
    %359 = vector.broadcast %cst_123 : f32 to vector<16x1xf32>
    %360 = arith.addf %356, %359 : vector<16x1xf32>
    %361 = math.rsqrt %360 : vector<16x1xf32>
    %362 = vector.broadcast %361 : vector<16x1xf32> to vector<16x64xf32>
    %363 = arith.mulf %358, %362 : vector<16x64xf32>
    %364 = vector.broadcast %343 : vector<1x64xf32> to vector<16x64xf32>
    %365 = arith.mulf %363, %364 : vector<16x64xf32>
    %366 = vector.broadcast %345 : vector<1x64xf32> to vector<16x64xf32>
    %367 = arith.addf %365, %366 : vector<16x64xf32>
    %368 = arith.truncf %367 : vector<16x64xf32> to vector<16x64xbf16>
    %c1_124 = arith.constant 1 : index
    %c0_125 = arith.constant 0 : index
    %c0_126 = arith.constant 0 : index
    %369 = vector.load %arg10[%c1_124, %c0_125, %c0_126] : memref<2x64x128xbf16, #tpu.memory_space<vmem>>, vector<1x64x128xbf16>
    %370 = vector.shape_cast %369 : vector<1x64x128xbf16> to vector<64x128xbf16>
    %cst_127 = arith.constant dense<0.000000e+00> : vector<16x128xf32>
    %371 = tpu.matmul %368, %370, %cst_127 {dimension_numbers = #tpu.dot_dimension_numbers<[1], [0], [0], [1], [0, 0, 1, 1], [], []>} : vector<16x64xbf16>, vector<64x128xbf16>, vector<16x128xf32> -> vector<16x128xf32>
    %c1_128 = arith.constant 1 : index
    %c0_129 = arith.constant 0 : index
    %c0_130 = arith.constant 0 : index
    %372 = vector.load %arg11[%c1_128, %c0_129, %c0_130] : memref<2x1x128xf32, #tpu.memory_space<vmem>>, vector<1x1x128xf32>
    %373 = vector.shape_cast %372 : vector<1x1x128xf32> to vector<1x128xf32>
    %374 = vector.broadcast %373 : vector<1x128xf32> to vector<16x128xf32>
    %375 = arith.addf %371, %374 : vector<16x128xf32>
    %cst_131 = arith.constant 0.000000e+00 : f32
    %376 = vector.broadcast %cst_131 : f32 to vector<16x128xf32>
    %377 = arith.maximumf %375, %376 : vector<16x128xf32>
    %378 = arith.truncf %377 : vector<16x128xf32> to vector<16x128xbf16>
    %c1_132 = arith.constant 1 : index
    %c0_133 = arith.constant 0 : index
    %c0_134 = arith.constant 0 : index
    %379 = vector.load %arg12[%c1_132, %c0_133, %c0_134] : memref<2x128x64xbf16, #tpu.memory_space<vmem>>, vector<1x128x64xbf16>
    %380 = vector.shape_cast %379 : vector<1x128x64xbf16> to vector<128x64xbf16>
    %cst_135 = arith.constant dense<0.000000e+00> : vector<16x64xf32>
    %381 = tpu.matmul %378, %380, %cst_135 {dimension_numbers = #tpu.dot_dimension_numbers<[1], [0], [0], [1], [0, 0, 1, 1], [], []>} : vector<16x128xbf16>, vector<128x64xbf16>, vector<16x64xf32> -> vector<16x64xf32>
    %c1_136 = arith.constant 1 : index
    %c0_137 = arith.constant 0 : index
    %c0_138 = arith.constant 0 : index
    %382 = vector.load %arg13[%c1_136, %c0_137, %c0_138] : memref<2x1x64xf32, #tpu.memory_space<vmem>>, vector<1x1x64xf32>
    %383 = vector.shape_cast %382 : vector<1x1x64xf32> to vector<1x64xf32>
    %384 = vector.broadcast %383 : vector<1x64xf32> to vector<16x64xf32>
    %385 = arith.addf %381, %384 : vector<16x64xf32>
    %386 = arith.addf %385, %367 : vector<16x64xf32>
    %c1_139 = arith.constant 1 : index
    %c0_140 = arith.constant 0 : index
    %c0_141 = arith.constant 0 : index
    %387 = vector.load %arg14[%c1_139, %c0_140, %c0_141] : memref<2x1x64xf32, #tpu.memory_space<vmem>>, vector<1x1x64xf32>
    %388 = vector.shape_cast %387 : vector<1x1x64xf32> to vector<1x64xf32>
    %c1_142 = arith.constant 1 : index
    %c0_143 = arith.constant 0 : index
    %c0_144 = arith.constant 0 : index
    %389 = vector.load %arg15[%c1_142, %c0_143, %c0_144] : memref<2x1x64xf32, #tpu.memory_space<vmem>>, vector<1x1x64xf32>
    %390 = vector.shape_cast %389 : vector<1x1x64xf32> to vector<1x64xf32>
    %cst_145 = arith.constant dense<0.000000e+00> : vector<16xf32>
    %391 = vector.multi_reduction <add>, %386, %cst_145 [1] : vector<16x64xf32> to vector<16xf32>
    %392 = vector.shape_cast %391 : vector<16xf32> to vector<16x1xf32>
    %cst_146 = arith.constant 6.400000e+01 : f32
    %393 = vector.broadcast %cst_146 : f32 to vector<16x1xf32>
    %394 = arith.divf %392, %393 : vector<16x1xf32>
    %395 = vector.broadcast %394 : vector<16x1xf32> to vector<16x64xf32>
    %396 = arith.subf %386, %395 : vector<16x64xf32>
    %397 = arith.mulf %396, %396 : vector<16x64xf32>
    %cst_147 = arith.constant dense<0.000000e+00> : vector<16xf32>
    %398 = vector.multi_reduction <add>, %397, %cst_147 [1] : vector<16x64xf32> to vector<16xf32>
    %399 = vector.shape_cast %398 : vector<16xf32> to vector<16x1xf32>
    %cst_148 = arith.constant 6.400000e+01 : f32
    %400 = vector.broadcast %cst_148 : f32 to vector<16x1xf32>
    %401 = arith.divf %399, %400 : vector<16x1xf32>
    %402 = vector.broadcast %394 : vector<16x1xf32> to vector<16x64xf32>
    %403 = arith.subf %386, %402 : vector<16x64xf32>
    %cst_149 = arith.constant 9.99999974E-6 : f32
    %404 = vector.broadcast %cst_149 : f32 to vector<16x1xf32>
    %405 = arith.addf %401, %404 : vector<16x1xf32>
    %406 = math.rsqrt %405 : vector<16x1xf32>
    %407 = vector.broadcast %406 : vector<16x1xf32> to vector<16x64xf32>
    %408 = arith.mulf %403, %407 : vector<16x64xf32>
    %409 = vector.broadcast %388 : vector<1x64xf32> to vector<16x64xf32>
    %410 = arith.mulf %408, %409 : vector<16x64xf32>
    %411 = vector.broadcast %390 : vector<1x64xf32> to vector<16x64xf32>
    %412 = arith.addf %410, %411 : vector<16x64xf32>
    %413 = arith.truncf %412 : vector<16x64xf32> to vector<16x64xbf16>
    %c0_150 = arith.constant 0 : index
    %c0_151 = arith.constant 0 : index
    %414 = vector.load %arg16[%c0_150, %c0_151] : memref<64x32xbf16, #tpu.memory_space<vmem>>, vector<64x32xbf16>
    %cst_152 = arith.constant dense<0.000000e+00> : vector<16x32xf32>
    %415 = tpu.matmul %413, %414, %cst_152 {dimension_numbers = #tpu.dot_dimension_numbers<[1], [0], [0], [1], [0, 0, 1, 1], [], []>} : vector<16x64xbf16>, vector<64x32xbf16>, vector<16x32xf32> -> vector<16x32xf32>
    %c0_153 = arith.constant 0 : index
    %c0_154 = arith.constant 0 : index
    %416 = vector.load %arg17[%c0_153, %c0_154] : memref<1x32xf32, #tpu.memory_space<vmem>>, vector<1x32xf32>
    %417 = vector.broadcast %416 : vector<1x32xf32> to vector<16x32xf32>
    %418 = arith.addf %415, %417 : vector<16x32xf32>
    %c0_155 = arith.constant 0 : index
    %c0_156 = arith.constant 0 : index
    %419 = vector.load %arg18[%c0_155, %c0_156] : memref<16x32xf32, #tpu.memory_space<vmem>>, vector<16x32xf32>
    tpu.vector_store %arg18[%c0_155, %c0_156], %418 {strides = array<i32>} : memref<16x32xf32, #tpu.memory_space<vmem>>, vector<16x32xf32>,
    return
  }
}

</mosaic_0001>

<bundles_post_ra>
// kernel: tpu_custom_call.1
= control target key start
LH: loop header
LB: loop body
LE: loop exit
PB: predicated region body
PF: predicated region fallthrough
CT: control target
= control target key end

     0   :  { %s3496_s0 = inlined_call_operand.hbm [shape: f32[16,32], index: 0, kind: input, shape index: {}]   ;;  %s3497_s1 = inlined_call_operand.vmem [shape: f32[1,16], index: 1, kind: input, shape index: {}]   ;;  %s3498_s2 = inlined_call_operand.hbm [shape: bf16[32,64], index: 2, kind: input, shape index: {}]   ;;  %s3499_s3 = inlined_call_operand.hbm [shape: f32[1,64], index: 3, kind: input, shape index: {}]   ;;  %s3500_s4 = inlined_call_operand.vmem [shape: bf16[2,64,192], index: 4, kind: input, shape index: {}]   ;;  %s3501_s5 = inlined_call_operand.vmem [shape: f32[2,1,192], index: 5, kind: input, shape index: {}]   ;;  %s3502_s6 = inlined_call_operand.vmem [shape: bf16[2,64,64], index: 6, kind: input, shape index: {}]   ;;  %s3503_s7 = inlined_call_operand.hbm [shape: f32[2,1,64], index: 7, kind: input, shape index: {}]   ;;  %s3504_s8 = inlined_call_operand.hbm [shape: f32[2,1,64], index: 8, kind: input, shape index: {}]   ;;  %s3505_s9 = inlined_call_operand.hbm [shape: f32[2,1,64], index: 9, kind: input, shape index: {}]   ;;  %s3506_s10 = inlined_call_operand.hbm [shape: bf16[2,64,128], index: 10, kind: input, shape index: {}]   ;;  %s3507_s11 = inlined_call_operand.hbm [shape: f32[2,1,128], index: 11, kind: input, shape index: {}]   ;;  %s3508_s12 = inlined_call_operand.vmem [shape: bf16[2,128,64], index: 12, kind: input, shape index: {}]   ;;  %s3509_s13 = inlined_call_operand.hbm [shape: f32[2,1,64], index: 13, kind: input, shape index: {}]   ;;  %s3510_s14 = inlined_call_operand.vmem [shape: f32[2,1,64], index: 14, kind: input, shape index: {}]   ;;  %s3511_s15 = inlined_call_operand.vmem [shape: f32[2,1,64], index: 15, kind: input, shape index: {}]   ;;  %s3512_s16 = inlined_call_operand.vmem [shape: bf16[64,32], index: 16, kind: input, shape index: {}]   ;;  %s3513_s17 = inlined_call_operand.vmem [shape: f32[1,32], index: 17, kind: input, shape index: {}]   ;;  %s3514_s18 = inlined_call_operand.hbm [shape: f32[16,32], index: 18, kind: output, shape index: {}]  }
   0x1   :  { %3515 = sst [smem:[#allocation24_spill]] %s3496_s0 }
   0x2   :  { %3516 = sst [smem:[#allocation25_spill]] %s3497_s1 }
   0x3   :  { %3517 = sst [smem:[#allocation26_spill]] %s3498_s2 }
   0x4   :  { %23 = vsyncpa [#allocation3], 0 }
   0x5   :  { %24 = vsyncpa [#allocation6], 0 }
   0x6   :  { %25 = vsyncpa [#allocation9], 0 }
   0x7   :  { %26 = vsyncpa [#allocation12], 0 }
   0x8   :  { %27 = vsyncpa [#allocation15], 0 }
   0x9   :  { %28 = vsyncpa [#allocation4], 0  ;;  %s2885_s27 = smov [#allocation5]  }
   0xa   :  { %s48_s28 = sshll.u32 %s2885_s27, 4  ;;  %s49_s28 = int_to_ptr.vmem [resolvable:$true] %s48_s28 }
   0xb   :  { %s2681_s29 = scalar_lea.vmem %s49_s28, 256  ;;  %p2686_p1 = scmp.lt.s32.totalorder %s49_s28, %s49_s28 }
   0xc   :  { %p2682_p0 = scmp.ne.s32.totalorder %s49_s28, %s2681_s29  ;;  %p2687_p2 = scmp.lt.s32.totalorder %s2681_s29, %s2681_s29 }
   0xe   :  { %p2688_p3 = por %p2687_p2, %p2686_p1 }
  0x10   :  { %p2689_p4 = pnand %p2688_p3, %p2682_p0 }
  0x12   :  { %2692 = shalt.err (!%p2689_p4)
}
  0x13   :  { %s2886_s30 = smov 64   ;;  %s2887_s0 = smov 4  }
  0x14   :  { %s3518_s20 = sld [smem:[#allocation26_spill]]  ;;  %s2888_s21 = smov [#allocation8]  }
  0x15   :  { %s76_s22 = sshll.u32 %s2888_s21, 4  ;;  %s77_s22 = int_to_ptr.vmem [resolvable:$true] %s76_s22 }
  0x16   :  { %s2701_s2 = scalar_lea.vmem %s77_s22, 32  ;;  %p2706_p6 = scmp.lt.s32.totalorder %s77_s22, %s77_s22 }
  0x17   :  { %p2702_p5 = scmp.ne.s32.totalorder %s77_s22, %s2701_s2  ;;  %p2707_p7 = scmp.lt.s32.totalorder %s2701_s2, %s2701_s2 }
  0x19   :  { %p2708_p8 = por %p2707_p7, %p2706_p6 }
  0x1a   :  { %54 = dma.hbm_to_vmem [thread:$0]  %s3518_s20, 256, %s49_s28, [#allocation6], %s2886_s30, %s2886_s30, %s2887_s0  }
  0x1b   :  { %p2709_p9 = pnand %p2708_p8, %p2702_p5 }
  0x1d   :  { %2712 = shalt.err (!%p2709_p9)
}
  0x1e   :  { %s2889_s23 = smov 16   ;;  %s2890_s24 = smov 1  }
  0x1f   :  { %82 = dma.hbm_to_vmem [thread:$0]  %s3503_s7, 32, %s77_s22, [#allocation9], %s2889_s23, %s2889_s23, %s2890_s24  }
  0x20   :  { %s2891_s27 = smov [#allocation11]   ;;  %s2892_s29 = smov [#allocation14]  }
  0x21   :  { %s100_s28 = sshll.u32 %s2891_s27, 4  ;;  %s124_s19 = sshll.u32 %s2892_s29, 4  ;;  %s101_s28 = int_to_ptr.vmem [resolvable:$true] %s100_s28  ;;  %s125_s19 = int_to_ptr.vmem [resolvable:$true] %s124_s19 }
  0x22   :  { %s2721_s1 = scalar_lea.vmem %s101_s28, 32  ;;  %p2726_p11 = scmp.lt.s32.totalorder %s101_s28, %s101_s28 }
  0x23   :  { %p2722_p10 = scmp.ne.s32.totalorder %s101_s28, %s2721_s1  ;;  %p2727_p12 = scmp.lt.s32.totalorder %s2721_s1, %s2721_s1 }
  0x25   :  { %p2728_p13 = por %p2727_p12, %p2726_p11 }
  0x27   :  { %p2729_p0 = pnand %p2728_p13, %p2722_p10 }
  0x29   :  { %2732 = shalt.err (!%p2729_p0)
}
  0x2a   :  { %106 = dma.hbm_to_vmem [thread:$0]  %s3505_s9, 32, %s101_s28, [#allocation12], %s2889_s23, %s2889_s23, %s2890_s24  }
  0x2b   :  { %s2741_s7 = scalar_lea.vmem %s125_s19, 32  ;;  %p2746_p2 = scmp.lt.s32.totalorder %s125_s19, %s125_s19 }
  0x2c   :  { %p2742_p1 = scmp.ne.s32.totalorder %s125_s19, %s2741_s7  ;;  %p2747_p3 = scmp.lt.s32.totalorder %s2741_s7, %s2741_s7 }
  0x2e   :  { %p2748_p4 = por %p2747_p3, %p2746_p2 }
  0x30   :  { %p2749_p5 = pnand %p2748_p4, %p2742_p1 }
  0x32   :  { %2752 = shalt.err (!%p2749_p5)
}
  0x33   :  { %130 = dma.hbm_to_vmem [thread:$0]  %s3507_s11, 32, %s125_s19, [#allocation15], %s2889_s23, %s2889_s23, %s2890_s24  }
  0x34   :  { %s2893_s25 = smov [#allocation2]  }
  0x35   :  { %s34_s26 = sshll.u32 %s2893_s25, 4  ;;  %s35_s26 = int_to_ptr.vmem [resolvable:$true] %s34_s26 }
  0x36   :  { %s2761_s27 = scalar_lea.vmem %s35_s26, 256  ;;  %p2766_p7 = scmp.lt.s32.totalorder %s35_s26, %s35_s26 }
  0x37   :  { %p2762_p6 = scmp.ne.s32.totalorder %s35_s26, %s2761_s27  ;;  %p2767_p8 = scmp.lt.s32.totalorder %s2761_s27, %s2761_s27 }
  0x39   :  { %p2768_p9 = por %p2767_p8, %p2766_p7 }
  0x3b   :  { %p2769_p10 = pnand %p2768_p9, %p2762_p6 }
  0x3d   :  { %2772 = shalt.err (!%p2769_p10)
}
  0x3e   :  { %s2894_s9 = smov 128   ;;  %s2895_s28 = smov 8  }
  0x3f   :  { %s3519_s20 = sld [smem:[#allocation24_spill]]  ;;  %s2896_s11 = smov [#allocation7]  }
  0x40   :  { %s61_s19 = sshll.u32 %s2896_s11, 4  ;;  %s2897_s21 = smov [#allocation10]   ;;  %s62_s19 = int_to_ptr.vmem [resolvable:$true] %s61_s19 }
  0x41   :  { %s88_s7 = sshll.u32 %s2897_s21, 4  ;;  %s2781_s22 = scalar_lea.vmem %s62_s19, 16  ;;  %s89_s7 = int_to_ptr.vmem [resolvable:$true] %s88_s7 }
  0x42   :  { %p2782_p11 = scmp.ne.s32.totalorder %s62_s19, %s2781_s22  ;;  %s2785_s2 = scalar_lea.vmem %s62_s19, 32 }
  0x43   :  { %p2786_p12 = scmp.lt.s32.totalorder %s62_s19, %s62_s19  ;;  %p2787_p13 = scmp.lt.s32.totalorder %s2785_s2, %s2781_s22 }
  0x45   :  { %40 = dma.hbm_to_vmem [thread:$0]  %s3519_s20, 256, %s35_s26, [#allocation3], %s2894_s9, %s2894_s9, %s2895_s28  }
  0x46   :  { %p2788_p0 = por %p2787_p13, %p2786_p12 }
  0x48   :  { %p2789_p1 = pnand %p2788_p0, %p2782_p11 }
  0x4a   :  { %2792 = shalt.err (!%p2789_p1)
}
  0x4b   :  { %64 = dma.hbm_to_vmem [thread:$0]  %s3499_s3, 16, %s62_s19, [#allocation6]  }
  0x4c   :  { %s2801_s29 = scalar_lea.vmem %s89_s7, 32  ;;  %p2806_p3 = scmp.lt.s32.totalorder %s89_s7, %s89_s7 }
  0x4d   :  { %p2802_p2 = scmp.ne.s32.totalorder %s89_s7, %s2801_s29  ;;  %p2807_p4 = scmp.lt.s32.totalorder %s2801_s29, %s2801_s29 }
  0x4f   :  { %p2808_p5 = por %p2807_p4, %p2806_p3 }
  0x51   :  { %p2809_p6 = pnand %p2808_p5, %p2802_p2 }
  0x53   :  { %2812 = shalt.err (!%p2809_p6)
}
  0x54   :  { %94 = dma.hbm_to_vmem [thread:$0]  %s3504_s8, 32, %s89_s7, [#allocation9], %s2889_s23, %s2889_s23, %s2890_s24  }
  0x55   :  { %s2898_s20 = smov [#allocation13]   ;;  %s2899_s21 = smov [#allocation16]  }
  0x56   :  { %s112_s11 = sshll.u32 %s2898_s20, 4  ;;  %s138_s3 = sshll.u32 %s2899_s21, 4  ;;  %s113_s11 = int_to_ptr.vmem [resolvable:$true] %s112_s11  ;;  %s139_s3 = int_to_ptr.vmem [resolvable:$true] %s138_s3 }
  0x57   :  { %s2821_s19 = scalar_lea.vmem %s113_s11, 1024  ;;  %p2826_p8 = scmp.lt.s32.totalorder %s113_s11, %s113_s11 }
  0x58   :  { %p2822_p7 = scmp.ne.s32.totalorder %s113_s11, %s2821_s19  ;;  %p2827_p9 = scmp.lt.s32.totalorder %s2821_s19, %s2821_s19 }
  0x5a   :  { %p2828_p10 = por %p2827_p9, %p2826_p8 }
  0x5c   :  { %p2829_p11 = pnand %p2828_p10, %p2822_p7 }
  0x5e   :  { %2832 = shalt.err (!%p2829_p11)
}
  0x5f   :  { %118 = dma.hbm_to_vmem [thread:$0]  %s3506_s10, 1024, %s113_s11, [#allocation12], %s2886_s30, %s2886_s30, %s2887_s0  }
  0x60   :  { %s2841_s8 = scalar_lea.vmem %s139_s3, 32  ;;  %p2846_p13 = scmp.lt.s32.totalorder %s139_s3, %s139_s3 }
  0x61   :  { %p2842_p12 = scmp.ne.s32.totalorder %s139_s3, %s2841_s8  ;;  %p2847_p0 = scmp.lt.s32.totalorder %s2841_s8, %s2841_s8 }
  0x63   :  { %p2848_p1 = por %p2847_p0, %p2846_p13 }
  0x65   :  { %p2849_p2 = pnand %p2848_p1, %p2842_p12 }
  0x67   :  { %2852 = shalt.err (!%p2849_p2)
}
  0x68   :  { %144 = dma.hbm_to_vmem [thread:$0]  %s3509_s13, 32, %s139_s3, [#allocation15], %s2889_s23, %s2889_s23, %s2890_s24  }
  0x69   :  { %2873 = dma.done.wait [#allocation3], 256  }
  0x6a   :  { %2874 = vsyncadd [#allocation3], 4294967040 }
  0x6b   :  { %2875 = dma.done.wait [#allocation6], 272  }
  0x6c   :  { %2876 = vsyncadd [#allocation6], 4294967024 }
  0x6d   :  { %2877 = dma.done.wait [#allocation9], 64  }
  0x6e   :  { %2878 = vsyncadd [#allocation9], 4294967232 }
  0x6f   :  { %2879 = dma.done.wait [#allocation12], 1056  }
  0x70   :  { %2880 = vsyncadd [#allocation12], 4294966240 }
  0x71   :  { %2881 = dma.done.wait [#allocation15], 64  }
  0x72   :  { %2882 = vsyncadd [#allocation15], 4294967232  ;;  %v2900_v0 = vmov 0.0   ;;  %vm2901_vm0 = vmmov 0   ;;  %v2531_v1 = vld [vmem:[#allocation5 + $0x8] sm:$0xff]   ;;  %v2532_v2 = vld [vmem:[#allocation5] sm:$0xff]   ;;  %v252_v23 = vlaneseq }
  0x73   :  { %2329 = vmatprep.subr.bf16.mxu0 %v2900_v0  ;;  %2333 = vmatprep.mubr.msk.bf16.mxu0 %vm2901_vm0, %v2900_v0  ;;  %v181_v3 = vld [vmem:[#allocation2] sm:$0xff]  ;;  %v182_v4 = vld [vmem:[#allocation2 + $0x8] sm:$0xff]  ;;  %v2533_v5 = vld [vmem:[%s3500_s4 + $0x34] ss:$8 sps:$4 sm:$0xff]   ;;  %vm207_vm1 = vcmask 261120   ;;  %v2902_v14 = vmov 0  }
  0x74   :  { %2330 = vmatpush3.bf16.msra.mxu0 %v2531_v1  ;;  %v2535_v6 = vld [vmem:[%s3500_s4 + $0x30] ss:$8 sps:$4 sm:$0xff]   ;;  %v2536_v7 = vld [vmem:[%s3500_s4 + $0x24] ss:$8 sps:$4 sm:$0xff]   ;;  %v183_v8 = vpack.c.bf16 %v182_v4, %v181_v3  ;;  %400 = vmatprep.subr.bf16.mxu1 %v2533_v5  ;;  %v2538_v9 = vld [vmem:[%s3500_s4 + $0x20] ss:$8 sps:$4 sm:$0xff]  }
  0x75   :  { %2331 = vmatprep.subr.bf16.mxu0 %v2900_v0  ;;  %401 = vmatpush1.bf16.msra.mxu1 %v2535_v6  ;;  %v2539_v10 = vld [vmem:[%s3500_s4 + $0x14] ss:$8 sps:$4 sm:$0xff]   ;;  %v2541_v11 = vld [vmem:[%s3500_s4 + $0x10] ss:$8 sps:$4 sm:$0xff]   ;;  %v2542_v12 = vld [vmem:[%s3500_s4 + $0x4] ss:$8 sps:$4 sm:$0xff]  }
  0x76   :  { %402 = vmatprep.subr.bf16.mxu1 %v2536_v7  ;;  %v2544_v13 = vld [vmem:[%s3500_s4] ss:$8 sps:$4 sm:$0xff]   ;;  %424 = vmatprep.mubr.bf16.mxu1 %v2902_v14  ;;  %vm388_vm2 = vcmask 523264   ;;  %v3096_v24 = vshrl.u32 %v252_v23, 7  ;;  %v3098_v25 = vand.u32 127, %v252_v23  ;;  %s3520_s0 = sld [smem:[#allocation25_spill]] }
  0x77   :  { %v2130_v16 = vld [vmem:[#allocation7] ss:$0 sm:$0xff]  ;;  %vm489_vm15 = vcmask 130048   ;;  %s2904_s24 = smov 32   ;;  %s2905_s20 = smov 48  }
  0x78   :  { %2332 = vmatpush3.bf16.msra.mxu0 %v2532_v2  ;;  %v3101_v26 = vsub.s32 0, %v3096_v24  ;;  %vm312_vm3 = vcmp.ge.s32.totalorder %v3098_v25, 16  ;;  %vm313_vm4 = vcmp.lt.s32.totalorder %v3098_v25, 32  ;;  %v336_v27 = vld [vmem:[%s3501_s5] sm:$0x3]  ;;  %vm317_vm5 = vcmp.ge.s32.totalorder %v3098_v25, 32 }
  0x79   :  { %2337 = vmatprep.subr.bf16.mxu0 %v2900_v0  ;;  %403 = vmatpush1.bf16.msra.mxu1 %v2538_v9  ;;  %vm318_vm6 = vcmp.lt.s32.totalorder %v3098_v25, 48  ;;  %vm322_vm7 = vcmp.ge.s32.totalorder %v3098_v25, 48  ;;  %vm323_vm8 = vcmp.lt.s32.totalorder %v3098_v25, 64  ;;  %vm314_vm9 = vmand %vm312_vm3, %vm313_vm4  ;;  %vm308_vm11 = vcmp.lt.s32.totalorder %v3098_v25, 16 }
  0x7a   :  { %404 = vmatprep.subr.bf16.mxu1 %v2539_v10  ;;  %v341_v28 = vrot.slane %v336_v27, %v3101_v26  ;;  %vm319_vm10 = vmand %vm317_vm5, %vm318_vm6  ;;  %v3115_v32 = vsel %vm308_vm11, 1.0, %v2900_v0  ;;  %v3118_v33 = vsel %vm314_vm9, 1.0, %v2900_v0  ;;  %v344_v51 = vsub.s32 1, %v3096_v24 }
  0x7b   :  { %2334 = vmatmul.mubr.msk.bf16.vlgmr.msra.gmra.mxu0 %vm207_vm1, %v183_v8  ;;  %vm324_vm12 = vmand %vm322_vm7, %vm323_vm8  ;;  %v3121_v34 = vsel %vm319_vm10, 1.0, %v2900_v0  ;;  %v254_v8 = vadd.s32 8, %v3096_v24  ;;  %v261_v9 = vand.u32 1, %v3096_v24  ;;  %v285_v10 = vand.u32 1, %v3098_v25 }
  0x7c   :  { %2339 = vmatprep.mubr.msk.bf16.mxu0 %vm2901_vm0, %v2900_v0  ;;  %v3124_v35 = vsel %vm324_vm12, 1.0, %v2900_v0  ;;  %v345_v53 = vrot.slane %v336_v27, %v344_v51  ;;  %v297_v7 = vld [vmem:[%s3520_s0] sm:$0x1]  ;;  %vm749_vm3 = vcmask 392192  }
  0x7d   :  { %405 = vmatpush1.bf16.msra.mxu1 %v2541_v11  ;;  %v298_v11 = vmul.f32 -1e+30, %v297_v7  ;;  %vm293_vm13 = vcmp.eq.s32.totalorder %v261_v9, %v285_v10 }
  0x7e   :  { %406 = vmatprep.subr.bf16.mxu1 %v2542_v12  ;;  %v268_v12 = vand.u32 1, %v254_v8 }
  0x80   :  { %vm294_vm14 = vcmp.eq.s32.totalorder %v268_v12, %v285_v10 }
  0x81   :  { %407 = vmatpush1.bf16.msra.mxu1 %v2544_v13  ;;  %v303_v13 = vrot.slane %v298_v11, %v3101_v26 }
  0x82   :  { %2349 = vmatprep.subr.bf16.mxu1 %v2900_v0 }
 0x13b   :  { %v245_v15 = vpop.f32.mrf.mxu0 }
 0x13c   :  { %v3087_v19 = vadd.f32 %v2130_v16, %v245_v15  ;;  %v2903_v15 = vmov -1e+30  }
 0x13d   :  { %v2335_v17 = vpop.f32.mrf.mxu0 }
 0x13f   :  { %v248_v18 = vpop.f32.mrf.mxu0 }
 0x140   :  { %v3089_v20 = vadd.f32 %v2130_v16, %v248_v18  ;;  %v295_v16 = vsel %vm293_vm13, 0.0, %v2903_v15  ;;  %v296_v18 = vsel %vm294_vm14, 0.0, %v2903_v15 }
 0x141   :  { %v2336_v21 = vpop.f32.mrf.mxu0  ;;  %v3174_v17 = vadd.f32 %v303_v13, %v295_v16  ;;  %v3176_v23 = vadd.f32 %v303_v13, %v296_v18 }
 0x142   :  { %v327_v22 = vpack.c.bf16 %v3089_v20, %v3087_v19 }
 0x144   :  { %2146 = vmatmul.mubr.msk.bf16.vlgmr.msra.gmra.mxu1 %vm388_vm2, %v327_v22 }
 0x145   :  { %2351 = vmatprep.mubr.msk.bf16.mxu1 %vm2901_vm0, %v2900_v0 }
 0x204   :  { %v426_v29 = vpop.f32.mrf.mxu1 }
 0x205   :  { %v427_v30 = vadd.f32 %v426_v29, %v341_v28 }
 0x206   :  { %v428_v31 = vpop.f32.mrf.mxu1 }
 0x207   :  { %v436_v38 = vmul.f32 %v3115_v32, %v427_v30  ;;  %v516_v39 = vmul.f32 %v3118_v33, %v427_v30  ;;  %v589_v40 = vmul.f32 %v3121_v34, %v427_v30  ;;  %v662_v41 = vmul.f32 %v3124_v35, %v427_v30 }
 0x208   :  { %v430_v36 = vpop.f32.mrf.mxu1  ;;  %v429_v57 = vadd.f32 %v428_v31, %v345_v53 }
 0x209   :  { %v431_v37 = vadd.f32 %v430_v36, %v341_v28 }
 0x20a   :  { %v432_v52 = vpop.f32.mrf.mxu1  ;;  %v732_v59 = vmul.f32 %v3124_v35, %v429_v57  ;;  %v659_v62 = vmul.f32 %v3121_v34, %v429_v57  ;;  %v586_v2 = vmul.f32 %v3118_v33, %v429_v57  ;;  %v513_v5 = vmul.f32 %v3115_v32, %v429_v57 }
 0x20b   :  { %v437_v42 = vmul.f32 %v3115_v32, %v431_v37  ;;  %v517_v43 = vmul.f32 %v3118_v33, %v431_v37  ;;  %v590_v44 = vmul.f32 %v3121_v34, %v431_v37  ;;  %v663_v45 = vmul.f32 %v3124_v35, %v431_v37 }
 0x20c   :  { %v435_v46 = vpack.c.bf16 %v431_v37, %v427_v30  ;;  %v433_v54 = vadd.f32 %v432_v52, %v345_v53 }
 0x20d   :  { %v438_v47 = vpack.c.bf16 %v437_v42, %v436_v38  ;;  %v591_v48 = vpack.c.bf16 %v590_v44, %v589_v40  ;;  %v518_v49 = vpack.c.bf16 %v517_v43, %v516_v39  ;;  %v664_v50 = vpack.c.bf16 %v663_v45, %v662_v41 }
 0x20e   :  { %440 = vrot.lane.b32.xlu0 %v435_v46, %s2886_s30  ;;  %v733_v58 = vmul.f32 %v3124_v35, %v433_v54  ;;  %v660_v60 = vmul.f32 %v3121_v34, %v433_v54  ;;  %v587_v63 = vmul.f32 %v3118_v33, %v433_v54  ;;  %v514_v3 = vmul.f32 %v3115_v32, %v433_v54 }
 0x210   :  { %v734_v61 = vpack.c.bf16 %v733_v58, %v732_v59  ;;  %v661_v1 = vpack.c.bf16 %v660_v60, %v659_v62  ;;  %v588_v4 = vpack.c.bf16 %v587_v63, %v586_v2  ;;  %v515_v6 = vpack.c.bf16 %v514_v3, %v513_v5 }
 0x280   :  { %v441_v55 = vpop.permute.xlu0 %440 }
 0x281   :  { %v446_v56 = vsel %vm388_vm2, %v441_v55, 0 }
 0x282   :  { %2338 = vmatpush3.bf16.xpose.msra.mxu0 %v446_v56  ;;  %2350 = vmatpush3.bf16.xpose.msra.mxu1 %v446_v56 }
 0x283   :  { %2343 = vmatprep.subr.bf16.mxu0 %v2900_v0  ;;  %2361 = vmatprep.subr.bf16.mxu1 %v2900_v0 }
 0x289   :  { %2340 = vmatmul.mubr.msk.bf16.vlgmr.msra.gmra.mxu0 %vm388_vm2, %v438_v47  ;;  %2352 = vmatmul.mubr.msk.bf16.vlgmr.msra.gmra.mxu1 %vm388_vm2, %v591_v48 }
 0x28a   :  { %2344 = vmatpush3.bf16.xpose.msra.mxu0 %v446_v56  ;;  %2362 = vmatpush3.bf16.msra.mxu1 %v734_v61 }
 0x28b   :  { %2363 = vmatprep.subr.bf16.mxu1 %v2900_v0  ;;  %2345 = vmatprep.mubr.msk.bf16.mxu0 %vm2901_vm0, %v2900_v0 }
 0x28c   :  { %2355 = vmatprep.subr.bf16.mxu0 %v2900_v0  ;;  %2369 = vmatprep.mubr.msk.bf16.mxu1 %vm2901_vm0, %v2900_v0 }
 0x28e   :  { %2364 = vmatpush3.bf16.msra.mxu1 %v661_v1 }
 0x28f   :  { %2365 = vmatprep.subr.bf16.mxu1 %v2900_v0 }
 0x291   :  { %2346 = vmatmul.mubr.msk.bf16.vlgmr.msra.gmra.mxu0 %vm388_vm2, %v518_v49 }
 0x292   :  { %2356 = vmatpush3.bf16.xpose.msra.mxu0 %v446_v56  ;;  %2366 = vmatpush3.bf16.msra.mxu1 %v588_v4 }
 0x293   :  { %2367 = vmatprep.subr.bf16.mxu1 %v2900_v0  ;;  %2357 = vmatprep.mubr.msk.bf16.mxu0 %vm2901_vm0, %v2900_v0 }
 0x294   :  { %2373 = vmatprep.subr.bf16.mxu0 %v2900_v0 }
 0x296   :  { %2368 = vmatpush3.bf16.msra.mxu1 %v515_v6 }
 0x297   :  { %2385 = vmatprep.subr.bf16.mxu1 %v2900_v0 }
 0x299   :  { %2358 = vmatmul.mubr.msk.bf16.vlgmr.msra.gmra.mxu0 %vm388_vm2, %v664_v50 }
 0x29a   :  { %2381 = vmatprep.mubr.msk.bf16.mxu0 %vm2901_vm0, %v2900_v0 }
 0x349   :  { %v482_v21 = vpop.f32.mrf.mxu0  ;;  %v629_v22 = vpop.f32.mrf.mxu1 }
 0x34a   :  { %v630_v27 = vadd.f32 %v629_v22, %v3174_v17  ;;  %v483_v56 = vadd.f32 %v482_v21, %v3174_v17 }
 0x34b   :  { %v2341_v28 = vpop.f32.mrf.mxu0  ;;  %v2353_v25 = vpop.f32.mrf.mxu1 }
 0x34c   :  { %v636_v29 = vsel %vm489_vm15, %v630_v27, -inf  ;;  %v490_v59 = vsel %vm489_vm15, %v483_v56, -inf }
 0x34d   :  { %637 = vmax.xlane.f32.xlu1 %v636_v29  ;;  %v485_v30 = vpop.f32.mrf.mxu0  ;;  %v632_v31 = vpop.f32.mrf.mxu1 }
 0x34e   :  { %v633_v36 = vadd.f32 %v632_v31, %v3176_v23  ;;  %v486_v58 = vadd.f32 %v485_v30, %v3176_v23 }
 0x34f   :  { %v2342_v37 = vpop.f32.mrf.mxu0  ;;  %v2354_v38 = vpop.f32.mrf.mxu1 }
 0x350   :  { %v639_v39 = vsel %vm489_vm15, %v633_v36, -inf  ;;  %v493_v60 = vsel %vm489_vm15, %v486_v58, -inf }
 0x351   :  { %640 = vmax.xlane.f32.xlu1 %v639_v39  ;;  %v556_v40 = vpop.f32.mrf.mxu0 }
 0x352   :  { %v557_v41 = vadd.f32 %v556_v40, %v3174_v17 }
 0x353   :  { %v2347_v42 = vpop.f32.mrf.mxu0 }
 0x354   :  { %v563_v43 = vsel %vm489_vm15, %v557_v41, -inf }
 0x355   :  { %564 = vmax.xlane.f32.xlu0 %v563_v43  ;;  %v559_v44 = vpop.f32.mrf.mxu0 }
 0x356   :  { %v560_v45 = vadd.f32 %v559_v44, %v3176_v23 }
 0x357   :  { %v2348_v46 = vpop.f32.mrf.mxu0 }
 0x358   :  { %v566_v47 = vsel %vm489_vm15, %v560_v45, -inf }
 0x359   :  { %567 = vmax.xlane.f32.xlu1 %v566_v47  ;;  %v702_v48 = vpop.f32.mrf.mxu0 }
 0x35a   :  { %v703_v49 = vadd.f32 %v702_v48, %v3174_v17 }
 0x35b   :  { %v2359_v50 = vpop.f32.mrf.mxu0 }
 0x35c   :  { %v709_v52 = vsel %vm489_vm15, %v703_v49, -inf }
 0x35d   :  { %710 = vmax.xlane.f32.xlu1 %v709_v52  ;;  %v705_v53 = vpop.f32.mrf.mxu0 }
 0x35e   :  { %v706_v54 = vadd.f32 %v705_v53, %v3176_v23 }
 0x35f   :  { %v2360_v55 = vpop.f32.mrf.mxu0 }
 0x360   :  { %v712_v57 = vsel %vm489_vm15, %v706_v54, -inf }
 0x361   :  { %713 = vmax.xlane.f32.xlu1 %v712_v57 }
 0x365   :  { %491 = vmax.xlane.f32.xlu1 %v490_v59 }
 0x369   :  { %494 = vmax.xlane.f32.xlu1 %v493_v60 }
 0x3d6   :  { %v638_v61 = vpop.xlane.xlu1 %637 }
 0x3d7   :  { %v642_v62 = vsub.f32 %v630_v27, %v638_v61 }
 0x3d9   :  { %v644_v63 = vmul.f32 1.442695, %v642_v62 }
 0x3da   :  { %v641_v1 = vpop.xlane.xlu1 %640 }
 0x3db   :  { %2593 = vpow2.f32 %v644_v63  ;;  %v643_v2 = vsub.f32 %v633_v36, %v641_v1 }
 0x3dd   :  { %v646_v3 = vmul.f32 1.442695, %v643_v2  ;;  %v2545_v2 = vld [vmem:[%s3502_s6 + $0x18] sm:$0xff]  }
 0x3de   :  { %v565_v4 = vpop.xlane.xlu0 %564  ;;  %2374 = vmatpush3.bf16.msra.mxu0 %v2545_v2  ;;  %v2553_v2 = vld [vmem:[%s3508_s12 + $0x38] sm:$0xff]  }
 0x3df   :  { %2595 = vpow2.f32 %v646_v3  ;;  %v569_v5 = vsub.f32 %v557_v41, %v565_v4  ;;  %v2546_v4 = vld [vmem:[%s3502_s6 + $0x10] sm:$0xff]   ;;  %2375 = vmatprep.subr.bf16.mxu0 %v2900_v0 }
 0x3e1   :  { %v571_v6 = vmul.f32 1.442695, %v569_v5 }
 0x3e2   :  { %v568_v7 = vpop.xlane.xlu1 %567  ;;  %2376 = vmatpush3.bf16.msra.mxu0 %v2546_v4  ;;  %v2555_v4 = vld [vmem:[%s3508_s12 + $0x28] sm:$0xff]  }
 0x3e3   :  { %2597 = vpow2.f32 %v571_v6  ;;  %v570_v8 = vsub.f32 %v560_v45, %v568_v7  ;;  %2377 = vmatprep.subr.bf16.mxu0 %v2900_v0 }
 0x3e5   :  { %v573_v9 = vmul.f32 1.442695, %v570_v8 }
 0x3e6   :  { %v711_v10 = vpop.xlane.xlu1 %710 }
 0x3e7   :  { %2599 = vpow2.f32 %v573_v9  ;;  %v715_v11 = vsub.f32 %v703_v49, %v711_v10 }
 0x3e8   :  { %v2594_v12 = vpop.eup %2593 }
 0x3e9   :  { %v717_v13 = vmul.f32 1.442695, %v715_v11  ;;  %v648_v15 = vsel %vm489_vm15, %v2594_v12, 0.0 }
 0x3ea   :  { %649 = vadd.xlane.f32.xlu0 %v648_v15  ;;  %v714_v16 = vpop.xlane.xlu1 %713 }
 0x3eb   :  { %2601 = vpow2.f32 %v717_v13  ;;  %v716_v18 = vsub.f32 %v706_v54, %v714_v16 }
 0x3ec   :  { %v2596_v21 = vpop.eup %2595 }
 0x3ed   :  { %v719_v22 = vmul.f32 1.442695, %v716_v18  ;;  %v651_v27 = vsel %vm489_vm15, %v2596_v21, 0.0 }
 0x3ee   :  { %652 = vadd.xlane.f32.xlu1 %v651_v27  ;;  %v492_v28 = vpop.xlane.xlu1 %491 }
 0x3ef   :  { %2603 = vpow2.f32 %v719_v22  ;;  %v496_v25 = vsub.f32 %v483_v56, %v492_v28 }
 0x3f0   :  { %v2598_v29 = vpop.eup %2597 }
 0x3f1   :  { %v498_v30 = vmul.f32 1.442695, %v496_v25  ;;  %v575_v31 = vsel %vm489_vm15, %v2598_v29, 0.0 }
 0x3f2   :  { %576 = vadd.xlane.f32.xlu1 %v575_v31  ;;  %v495_v36 = vpop.xlane.xlu1 %494  ;;  %v2548_v31 = vld [vmem:[%s3502_s6] sm:$0xff]  }
 0x3f3   :  { %2605 = vpow2.f32 %v498_v30  ;;  %v497_v37 = vsub.f32 %v486_v58, %v495_v36  ;;  %v2547_v30 = vld [vmem:[%s3502_s6 + $0x8] sm:$0xff]  }
 0x3f4   :  { %v2600_v38 = vpop.eup %2599  ;;  %2378 = vmatpush3.bf16.msra.mxu0 %v2547_v30 }
 0x3f5   :  { %v500_v39 = vmul.f32 1.442695, %v497_v37  ;;  %v578_v40 = vsel %vm489_vm15, %v2600_v38, 0.0  ;;  %2379 = vmatprep.subr.bf16.mxu0 %v2900_v0 }
 0x3f6   :  { %579 = vadd.xlane.f32.xlu1 %v578_v40 }
 0x3f7   :  { %2607 = vpow2.f32 %v500_v39 }
 0x3f8   :  { %v2602_v41 = vpop.eup %2601  ;;  %2380 = vmatpush3.bf16.msra.mxu0 %v2548_v31  ;;  %v2558_v31 = vld [vmem:[%s3508_s12 + $0x10] sm:$0xff]  }
 0x3f9   :  { %v721_v42 = vsel %vm489_vm15, %v2602_v41, 0.0  ;;  %2397 = vmatprep.subr.bf16.mxu0 %v2900_v0 }
 0x3fa   :  { %722 = vadd.xlane.f32.xlu0 %v721_v42 }
 0x3fc   :  { %v2604_v43 = vpop.eup %2603 }
 0x3fd   :  { %v724_v44 = vsel %vm489_vm15, %v2604_v43, 0.0 }
 0x3fe   :  { %725 = vadd.xlane.f32.xlu1 %v724_v44 }
 0x400   :  { %v2606_v45 = vpop.eup %2605 }
 0x401   :  { %v502_v46 = vsel %vm489_vm15, %v2606_v45, 0.0 }
 0x402   :  { %503 = vadd.xlane.f32.xlu0 %v502_v46 }
 0x404   :  { %v2608_v47 = vpop.eup %2607 }
 0x405   :  { %v505_v48 = vsel %vm489_vm15, %v2608_v47, 0.0 }
 0x406   :  { %506 = vadd.xlane.f32.xlu1 %v505_v48 }
 0x473   :  { %v650_v49 = vpop.xlane.xlu0 %649 }
 0x474   :  { %2609 = vrcp.f32 %v650_v49 }
 0x477   :  { %v653_v50 = vpop.xlane.xlu1 %652 }
 0x478   :  { %2611 = vrcp.f32 %v653_v50 }
 0x47b   :  { %v577_v52 = vpop.xlane.xlu1 %576 }
 0x47c   :  { %2613 = vrcp.f32 %v577_v52 }
 0x47f   :  { %v580_v53 = vpop.xlane.xlu1 %579 }
 0x480   :  { %2615 = vrcp.f32 %v580_v53 }
 0x481   :  { %v2610_v54 = vpop.eup %2609 }
 0x482   :  { %v655_v57 = vmul.f32 %v2610_v54, %v2594_v12 }
 0x483   :  { %v723_v55 = vpop.xlane.xlu0 %722 }
 0x484   :  { %2617 = vrcp.f32 %v723_v55 }
 0x485   :  { %v2612_v56 = vpop.eup %2611 }
 0x486   :  { %v657_v58 = vmul.f32 %v2612_v56, %v2596_v21 }
 0x487   :  { %v726_v59 = vpop.xlane.xlu1 %725 }
 0x488   :  { %2619 = vrcp.f32 %v726_v59  ;;  %v658_v60 = vpack.c.bf16 %v657_v58, %v655_v57 }
 0x489   :  { %v2614_v61 = vpop.eup %2613 }
 0x48a   :  { %739 = vrot.lane.b32.xlu1 %v658_v60, %s2904_s24  ;;  %v582_v63 = vmul.f32 %v2614_v61, %v2598_v29 }
 0x48b   :  { %v504_v11 = vpop.xlane.xlu0 %503 }
 0x48d   :  { %v2616_v62 = vpop.eup %2615 }
 0x48e   :  { %v584_v1 = vmul.f32 %v2616_v62, %v2600_v38  ;;  %v2549_v62 = vld [vmem:[#allocation13 + $0x18] sm:$0xff]  }
 0x48f   :  { %v507_v10 = vpop.xlane.xlu1 %506 }
 0x490   :  { %v585_v3 = vpack.c.bf16 %v584_v1, %v582_v63  ;;  %2621 = vrcp.f32 %v507_v10  ;;  %v2551_v63 = vld [vmem:[#allocation13 + $0x8] sm:$0xff]   ;;  %v2552_v1 = vld [vmem:[#allocation13] sm:$0xff]  }
 0x491   :  { %v2618_v5 = vpop.eup %2617  ;;  %2623 = vrcp.f32 %v504_v11 }
 0x492   :  { %736 = vrot.lane.b32.xlu0 %v585_v3, %s2889_s23  ;;  %v728_v7 = vmul.f32 %v2618_v5, %v2602_v41  ;;  %v2152_v41 = vld [vmem:[#allocation8] ss:$0 sm:$0xff]  ;;  %v2554_v3 = vld [vmem:[%s3508_s12 + $0x30] sm:$0xff]  }
 0x493   :  { %v2556_v5 = vld [vmem:[%s3508_s12 + $0x20] sm:$0xff]  }
 0x495   :  { %v2620_v6 = vpop.eup %2619 }
 0x496   :  { %v730_v8 = vmul.f32 %v2620_v6, %v2604_v43  ;;  %v2557_v6 = vld [vmem:[%s3508_s12 + $0x18] sm:$0xff]  }
 0x498   :  { %v731_v9 = vpack.c.bf16 %v730_v8, %v728_v7 }
 0x49a   :  { %742 = vrot.lane.b32.xlu1 %v731_v9, %s2905_s20 }
 0x49d   :  { %v2622_v12 = vpop.eup %2621 }
 0x49e   :  { %v2624_v13 = vpop.eup %2623  ;;  %v511_v15 = vmul.f32 %v2622_v12, %v2608_v47 }
 0x49f   :  { %v509_v16 = vmul.f32 %v2624_v13, %v2606_v45 }
 0x4a1   :  { %v512_v21 = vpack.c.bf16 %v511_v15, %v509_v16  ;;  %v2158_v16 = vld [vmem:[#allocation10] ss:$0 sm:$0xff] }
 0x4fc   :  { %v740_v22 = vpop.permute.xlu1 %739 }
 0x504   :  { %v737_v18 = vpop.permute.xlu0 %736 }
 0x505   :  { %v746_v27 = vsel %vm489_vm15, %v512_v21, %v737_v18 }
 0x506   :  { %v748_v28 = vsel %vm207_vm1, %v746_v27, %v740_v22  ;;  %v2159_v27 = vld [vmem:[#allocation11] ss:$0 sm:$0xff] }
 0x50c   :  { %v743_v25 = vpop.permute.xlu1 %742 }
 0x50d   :  { %v751_v29 = vsel %vm749_vm3, %v748_v28, %v743_v25 }
 0x50e   :  { %2370 = vmatmul.mubr.msk.bf16.vlgmr.msra.gmra.mxu1 %vm388_vm2, %v751_v29 }
 0x50f   :  { %2393 = vmatprep.mubr.msk.bf16.mxu1 %vm2901_vm0, %v2900_v0  ;;  %2386 = vmatpush3.bf16.msra.mxu1 %v2549_v62 }
 0x510   :  { %2387 = vmatprep.subr.bf16.mxu1 %v2900_v0 }
 0x5ce   :  { %v788_v36 = vpop.f32.mrf.mxu1 }
 0x5d0   :  { %v2371_v37 = vpop.f32.mrf.mxu1 }
 0x5d1   :  { %v2560_v37 = vld [vmem:[%s3508_s12] sm:$0xff]  }
 0x5d2   :  { %v791_v38 = vpop.f32.mrf.mxu1 }
 0x5d3   :  { %v795_v39 = vpack.c.bf16 %v791_v38, %v788_v36  ;;  %v2559_v36 = vld [vmem:[%s3508_s12 + $0x8] sm:$0xff]  }
 0x5d4   :  { %v2372_v40 = vpop.f32.mrf.mxu1 }
 0x5d5   :  { %2382 = vmatmul.mubr.msk.bf16.vlgmr.msra.gmra.mxu0 %vm388_vm2, %v795_v39 }
 0x5d6   :  { %2413 = vmatprep.mubr.msk.bf16.mxu0 %vm2901_vm0, %v2900_v0  ;;  %2398 = vmatpush3.bf16.msra.mxu0 %v2553_v2 }
 0x5d7   :  { %2399 = vmatprep.subr.bf16.mxu0 %v2900_v0 }
 0x5da   :  { %2400 = vmatpush3.bf16.msra.mxu0 %v2554_v3 }
 0x5db   :  { %2401 = vmatprep.subr.bf16.mxu0 %v2900_v0 }
 0x5de   :  { %2402 = vmatpush3.bf16.msra.mxu0 %v2555_v4  ;;  %v2563_v4 = vld [vmem:[%s3500_s4 + $0x74] ss:$8 sps:$4 sm:$0xff]  }
 0x5df   :  { %2403 = vmatprep.subr.bf16.mxu0 %v2900_v0 }
 0x5e2   :  { %2404 = vmatpush3.bf16.msra.mxu0 %v2556_v5  ;;  %v2561_v5 = vld [vmem:[%s3500_s4 + $0x70] ss:$8 sps:$4 sm:$0xff]  }
 0x5e3   :  { %2405 = vmatprep.subr.bf16.mxu0 %v2900_v0 }
 0x5e6   :  { %2406 = vmatpush3.bf16.msra.mxu0 %v2557_v6  ;;  %v2566_v6 = vld [vmem:[%s3500_s4 + $0x64] ss:$8 sps:$4 sm:$0xff]  }
 0x5e7   :  { %2407 = vmatprep.subr.bf16.mxu0 %v2900_v0 }
 0x5ea   :  { %2408 = vmatpush3.bf16.msra.mxu0 %v2558_v31  ;;  %v2176_v31 = vld [vmem:[%s3511_s15] ss:$0 sm:$0xff] }
 0x5eb   :  { %2409 = vmatprep.subr.bf16.mxu0 %v2900_v0 }
 0x5ee   :  { %2410 = vmatpush3.bf16.msra.mxu0 %v2559_v36 }
 0x5ef   :  { %2411 = vmatprep.subr.bf16.mxu0 %v2900_v0 }
 0x5f2   :  { %2412 = vmatpush3.bf16.msra.mxu0 %v2560_v37 }
 0x5f3   :  { %2423 = vmatprep.subr.bf16.mxu0 %v2900_v0 }
 0x695   :  { %v872_v42 = vpop.f32.mrf.mxu0 }
 0x696   :  { %v873_v43 = vadd.f32 %v2152_v41, %v872_v42 }
 0x697   :  { %v2383_v44 = vpop.f32.mrf.mxu0 }
 0x698   :  { %v879_v45 = vadd.f32 %v873_v43, %v3087_v19 }
 0x699   :  { %v875_v46 = vpop.f32.mrf.mxu0 }
 0x69a   :  { %v876_v47 = vadd.f32 %v2152_v41, %v875_v46  ;;  %v883_v48 = vsel %vm388_vm2, %v879_v45, 0.0 }
 0x69b   :  { %884 = vadd.xlane.f32.xlu0 %v883_v48  ;;  %v2384_v49 = vpop.f32.mrf.mxu0 }
 0x69c   :  { %v880_v50 = vadd.f32 %v876_v47, %v3089_v20  ;;  %v2550_v20 = vld [vmem:[#allocation13 + $0x10] sm:$0xff]   ;;  %v2166_v47 = vld [vmem:[#allocation16] ss:$0 sm:$0xff] }
 0x69d   :  { %2388 = vmatpush3.bf16.msra.mxu1 %v2550_v20 }
 0x69e   :  { %v886_v52 = vsel %vm388_vm2, %v880_v50, 0.0  ;;  %2389 = vmatprep.subr.bf16.mxu1 %v2900_v0 }
 0x69f   :  { %887 = vadd.xlane.f32.xlu1 %v886_v52 }
 0x6a1   :  { %2390 = vmatpush3.bf16.msra.mxu1 %v2551_v63 }
 0x6a2   :  { %2391 = vmatprep.subr.bf16.mxu1 %v2900_v0 }
 0x6a5   :  { %2392 = vmatpush3.bf16.msra.mxu1 %v2552_v1 }
 0x6a6   :  { %1245 = vmatprep.subr.bf16.mxu1 %v2563_v4 }
 0x724   :  { %v885_v53 = vpop.xlane.xlu0 %884 }
 0x725   :  { %v890_v54 = vmul.f32 0.015625, %v885_v53 }
 0x727   :  { %v892_v55 = vsub.f32 %v879_v45, %v890_v54 }
 0x728   :  { %v888_v56 = vpop.xlane.xlu1 %887 }
 0x729   :  { %v891_v57 = vmul.f32 0.015625, %v888_v56  ;;  %v894_v58 = vmul.f32 %v892_v55, %v892_v55 }
 0x72b   :  { %v893_v59 = vsub.f32 %v880_v50, %v891_v57  ;;  %v896_v19 = vsel %vm388_vm2, %v894_v58, 0.0 }
 0x72c   :  { %897 = vadd.xlane.f32.xlu0 %v896_v19 }
 0x72d   :  { %v895_v60 = vmul.f32 %v893_v59, %v893_v59 }
 0x72f   :  { %v899_v61 = vsel %vm388_vm2, %v895_v60, 0.0 }
 0x730   :  { %900 = vadd.xlane.f32.xlu0 %v899_v61 }
 0x7b5   :  { %v898_v7 = vpop.xlane.xlu0 %897 }
 0x7b6   :  { %v902_v8 = vmul.f32 0.015625, %v898_v7  ;;  %v2564_v7 = vld [vmem:[%s3500_s4 + $0x60] ss:$8 sps:$4 sm:$0xff]  }
 0x7b8   :  { %v904_v9 = vadd.f32 1e-05, %v902_v8  ;;  %v2569_v8 = vld [vmem:[%s3500_s4 + $0x54] ss:$8 sps:$4 sm:$0xff]  }
 0x7b9   :  { %v901_v10 = vpop.xlane.xlu0 %900 }
 0x7ba   :  { %2625 = vrsqrt.f32 %v904_v9  ;;  %v903_v11 = vmul.f32 0.015625, %v901_v10  ;;  %v2567_v9 = vld [vmem:[%s3500_s4 + $0x50] ss:$8 sps:$4 sm:$0xff]   ;;  %v2572_v10 = vld [vmem:[%s3500_s4 + $0x44] ss:$8 sps:$4 sm:$0xff]  }
 0x7bc   :  { %v905_v12 = vadd.f32 1e-05, %v903_v11  ;;  %v2570_v11 = vld [vmem:[%s3500_s4 + $0x40] ss:$8 sps:$4 sm:$0xff]  }
 0x7be   :  { %2627 = vrsqrt.f32 %v905_v12 }
 0x7c7   :  { %v2626_v13 = vpop.eup %2625 }
 0x7c8   :  { %v908_v15 = vmul.f32 %v2626_v13, %v892_v55 }
 0x7ca   :  { %v916_v22 = vmul.f32 %v2158_v16, %v908_v15 }
 0x7cb   :  { %v2628_v18 = vpop.eup %2627 }
 0x7cc   :  { %v909_v21 = vmul.f32 %v2628_v18, %v893_v59  ;;  %v924_v25 = vadd.f32 %v2159_v27, %v916_v22 }
 0x7ce   :  { %v917_v28 = vmul.f32 %v2158_v16, %v909_v21 }
 0x7d0   :  { %v925_v29 = vadd.f32 %v2159_v27, %v917_v28  ;;  %v2175_v28 = vld [vmem:[%s3510_s14] ss:$0 sm:$0xff] }
 0x7d2   :  { %v926_v30 = vpack.c.bf16 %v925_v29, %v924_v25 }
 0x7d4   :  { %2394 = vmatmul.mubr.msk.bf16.vlgmr.msra.gmra.mxu1 %vm388_vm2, %v926_v30 }
 0x7d5   :  { %1269 = vmatprep.mubr.bf16.mxu1 %v2902_v14  ;;  %v2160_v14 = vld [vmem:[#allocation14] ss:$0 sm:$0xff]  ;;  %1246 = vmatpush1.bf16.msra.mxu1 %v2561_v5 }
 0x7d6   :  { %1247 = vmatprep.subr.bf16.mxu1 %v2566_v6 }
 0x7d9   :  { %1248 = vmatpush1.bf16.msra.mxu1 %v2564_v7 }
 0x7da   :  { %1249 = vmatprep.subr.bf16.mxu1 %v2569_v8 }
 0x7dd   :  { %1250 = vmatpush1.bf16.msra.mxu1 %v2567_v9 }
 0x7de   :  { %1251 = vmatprep.subr.bf16.mxu1 %v2572_v10 }
 0x7e1   :  { %1252 = vmatpush1.bf16.msra.mxu1 %v2570_v11 }
 0x7e2   :  { %2417 = vmatprep.subr.bf16.mxu1 %v2900_v0 }
 0x894   :  { %v1003_v38 = vpop.f32.mrf.mxu1 }
 0x895   :  { %v1004_v40 = vadd.f32 %v2160_v14, %v1003_v38 }
 0x896   :  { %v2395_v39 = vpop.f32.mrf.mxu1 }
 0x897   :  { %v1010_v44 = vmax.f32 %v1004_v40, 0.0  ;;  %v2185_v39 = vld [vmem:[%s3501_s5 + $0x2] sm:$0x3] }
 0x898   :  { %v1006_v41 = vpop.f32.mrf.mxu1  ;;  %v1187_v40 = vrot.slane %v2185_v39, %v3101_v26 }
 0x899   :  { %v1007_v42 = vadd.f32 %v2160_v14, %v1006_v41 }
 0x89a   :  { %v2396_v43 = vpop.f32.mrf.mxu1 }
 0x89b   :  { %v1011_v45 = vmax.f32 %v1007_v42, 0.0 }
 0x89d   :  { %v1012_v46 = vpack.c.bf16 %v1011_v45, %v1010_v44 }
 0x89f   :  { %2414 = vmatmul.mubr.bf16.vlgmr.msra.gmra.mxu0 %v1012_v46 }
 0x8a0   :  { %2425 = vmatprep.mubr.msk.bf16.mxu0 %vm2901_vm0, %v2900_v0 }
 0x95f   :  { %v1118_v48 = vpop.f32.mrf.mxu0 }
 0x960   :  { %v1119_v49 = vadd.f32 %v2166_v47, %v1118_v48 }
 0x961   :  { %v2415_v50 = vpop.f32.mrf.mxu0 }
 0x962   :  { %v1125_v52 = vadd.f32 %v1119_v49, %v924_v25 }
 0x963   :  { %v1121_v53 = vpop.f32.mrf.mxu0 }
 0x964   :  { %v1122_v54 = vadd.f32 %v2166_v47, %v1121_v53  ;;  %v1129_v55 = vsel %vm388_vm2, %v1125_v52, 0.0 }
 0x965   :  { %1130 = vadd.xlane.f32.xlu1 %v1129_v55  ;;  %v2416_v56 = vpop.f32.mrf.mxu0 }
 0x966   :  { %v1126_v57 = vadd.f32 %v1122_v54, %v925_v29 }
 0x968   :  { %v1132_v58 = vsel %vm388_vm2, %v1126_v57, 0.0 }
 0x969   :  { %1133 = vadd.xlane.f32.xlu0 %v1132_v58 }
 0x9ee   :  { %v1131_v59 = vpop.xlane.xlu1 %1130 }
 0x9ef   :  { %v1135_v19 = vmul.f32 0.015625, %v1131_v59 }
 0x9f1   :  { %v1137_v60 = vsub.f32 %v1125_v52, %v1135_v19 }
 0x9f2   :  { %v1134_v61 = vpop.xlane.xlu0 %1133 }
 0x9f3   :  { %v1136_v62 = vmul.f32 0.015625, %v1134_v61  ;;  %v1139_v20 = vmul.f32 %v1137_v60, %v1137_v60  ;;  %v1191_v61 = vrot.slane %v2185_v39, %v344_v51 }
 0x9f5   :  { %v1138_v63 = vsub.f32 %v1126_v57, %v1136_v62  ;;  %v1141_v1 = vsel %vm388_vm2, %v1139_v20, 0.0 }
 0x9f6   :  { %1142 = vadd.xlane.f32.xlu1 %v1141_v1 }
 0x9f7   :  { %v1140_v2 = vmul.f32 %v1138_v63, %v1138_v63 }
 0x9f9   :  { %v1144_v3 = vsel %vm388_vm2, %v1140_v2, 0.0 }
 0x9fa   :  { %1145 = vadd.xlane.f32.xlu0 %v1144_v3 }
 0xa7f   :  { %v1143_v12 = vpop.xlane.xlu1 %1142 }
 0xa80   :  { %v1147_v13 = vmul.f32 0.015625, %v1143_v12 }
 0xa82   :  { %v1149_v15 = vadd.f32 1e-05, %v1147_v13 }
 0xa83   :  { %v1146_v16 = vpop.xlane.xlu0 %1145 }
 0xa84   :  { %2629 = vrsqrt.f32 %v1149_v15  ;;  %v1148_v18 = vmul.f32 0.015625, %v1146_v16 }
 0xa86   :  { %v1150_v21 = vadd.f32 1e-05, %v1148_v18 }
 0xa88   :  { %2631 = vrsqrt.f32 %v1150_v21 }
 0xa91   :  { %v2630_v22 = vpop.eup %2629 }
 0xa92   :  { %v1153_v27 = vmul.f32 %v2630_v22, %v1137_v60 }
 0xa94   :  { %v1161_v30 = vmul.f32 %v2175_v28, %v1153_v27 }
 0xa95   :  { %v2632_v25 = vpop.eup %2631 }
 0xa96   :  { %v1154_v29 = vmul.f32 %v2632_v25, %v1138_v63  ;;  %v3310_v37 = vadd.f32 %v2176_v31, %v1161_v30 }
 0xa98   :  { %v1162_v36 = vmul.f32 %v2175_v28, %v1154_v29 }
 0xa9a   :  { %v3312_v14 = vadd.f32 %v2176_v31, %v1162_v36 }
 0xa9c   :  { %v1171_v38 = vpack.c.bf16 %v3312_v14, %v3310_v37 }
 0xa9e   :  { %2194 = vmatmul.mubr.msk.bf16.vlgmr.msra.gmra.mxu1 %vm388_vm2, %v1171_v38 }
 0xa9f   :  { %2419 = vmatprep.mubr.msk.bf16.mxu1 %vm2901_vm0, %v2900_v0 }
 0xb5e   :  { %v1271_v41 = vpop.f32.mrf.mxu1 }
 0xb5f   :  { %v1272_v42 = vadd.f32 %v1271_v41, %v1187_v40 }
 0xb60   :  { %v1273_v43 = vpop.f32.mrf.mxu1 }
 0xb61   :  { %v1281_v46 = vmul.f32 %v3115_v32, %v1272_v42  ;;  %v1360_v47 = vmul.f32 %v3118_v33, %v1272_v42  ;;  %v1433_v48 = vmul.f32 %v3121_v34, %v1272_v42  ;;  %v1506_v49 = vmul.f32 %v3124_v35, %v1272_v42 }
 0xb62   :  { %v1275_v44 = vpop.f32.mrf.mxu1  ;;  %v1274_v20 = vadd.f32 %v1273_v43, %v1191_v61 }
 0xb63   :  { %v1276_v45 = vadd.f32 %v1275_v44, %v1187_v40 }
 0xb64   :  { %v1277_v60 = vpop.f32.mrf.mxu1  ;;  %v1576_v24 = vmul.f32 %v3124_v35, %v1274_v20  ;;  %v1503_v2 = vmul.f32 %v3121_v34, %v1274_v20  ;;  %v1430_v4 = vmul.f32 %v3118_v33, %v1274_v20  ;;  %v1357_v6 = vmul.f32 %v3115_v32, %v1274_v20 }
 0xb65   :  { %v1282_v50 = vmul.f32 %v3115_v32, %v1276_v45  ;;  %v1361_v52 = vmul.f32 %v3118_v33, %v1276_v45  ;;  %v1434_v53 = vmul.f32 %v3121_v34, %v1276_v45  ;;  %v1507_v26 = vmul.f32 %v3124_v35, %v1276_v45 }
 0xb66   :  { %v1280_v54 = vpack.c.bf16 %v1276_v45, %v1272_v42  ;;  %v1278_v62 = vadd.f32 %v1277_v60, %v1191_v61 }
 0xb67   :  { %v1283_v55 = vpack.c.bf16 %v1282_v50, %v1281_v46  ;;  %v1362_v56 = vpack.c.bf16 %v1361_v52, %v1360_v47  ;;  %v1435_v57 = vpack.c.bf16 %v1434_v53, %v1433_v48  ;;  %v1508_v58 = vpack.c.bf16 %v1507_v26, %v1506_v49 }
 0xb68   :  { %1285 = vrot.lane.b32.xlu1 %v1280_v54, %s2886_s30  ;;  %v1577_v63 = vmul.f32 %v3124_v35, %v1278_v62  ;;  %v1504_v51 = vmul.f32 %v3121_v34, %v1278_v62  ;;  %v1431_v35 = vmul.f32 %v3118_v33, %v1278_v62  ;;  %v1358_v5 = vmul.f32 %v3115_v32, %v1278_v62 }
 0xb6a   :  { %v1578_v1 = vpack.c.bf16 %v1577_v63, %v1576_v24  ;;  %v1505_v3 = vpack.c.bf16 %v1504_v51, %v1503_v2  ;;  %v1432_v34 = vpack.c.bf16 %v1431_v35, %v1430_v4  ;;  %v1359_v7 = vpack.c.bf16 %v1358_v5, %v1357_v6 }
 0xbda   :  { %v1286_v59 = vpop.permute.xlu1 %1285 }
 0xbdb   :  { %v1291_v19 = vsel %vm388_vm2, %v1286_v59, 0 }
 0xbdc   :  { %2418 = vmatpush3.bf16.xpose.msra.mxu1 %v1291_v19  ;;  %2424 = vmatpush3.bf16.xpose.msra.mxu0 %v1291_v19 }
 0xbdd   :  { %2429 = vmatprep.subr.bf16.mxu1 %v2900_v0  ;;  %2435 = vmatprep.subr.bf16.mxu0 %v2900_v0 }
 0xbe3   :  { %2420 = vmatmul.mubr.msk.bf16.vlgmr.msra.gmra.mxu1 %vm388_vm2, %v1283_v55  ;;  %2426 = vmatmul.mubr.msk.bf16.vlgmr.msra.gmra.mxu0 %vm388_vm2, %v1362_v56 }
 0xbe4   :  { %2430 = vmatpush3.bf16.xpose.msra.mxu1 %v1291_v19  ;;  %2436 = vmatpush3.bf16.xpose.msra.mxu0 %v1291_v19 }
 0xbe5   :  { %2431 = vmatprep.mubr.msk.bf16.mxu1 %vm2901_vm0, %v2900_v0  ;;  %2437 = vmatprep.mubr.msk.bf16.mxu0 %vm2901_vm0, %v2900_v0 }
 0xbe6   :  { %2441 = vmatprep.subr.bf16.mxu1 %v2900_v0  ;;  %2453 = vmatprep.subr.bf16.mxu0 %v2900_v0 }
 0xbeb   :  { %2432 = vmatmul.mubr.msk.bf16.vlgmr.msra.gmra.mxu1 %vm388_vm2, %v1435_v57  ;;  %2438 = vmatmul.mubr.msk.bf16.vlgmr.msra.gmra.mxu0 %vm388_vm2, %v1508_v58 }
 0xbec   :  { %2442 = vmatpush3.bf16.msra.mxu1 %v1578_v1  ;;  %2449 = vmatprep.mubr.msk.bf16.mxu1 %vm2901_vm0, %v2900_v0 }
 0xbed   :  { %2443 = vmatprep.subr.bf16.mxu1 %v2900_v0  ;;  %2461 = vmatprep.mubr.msk.bf16.mxu0 %vm2901_vm0, %v2900_v0 }
 0xbf0   :  { %2444 = vmatpush3.bf16.msra.mxu1 %v1505_v3 }
 0xbf1   :  { %2445 = vmatprep.subr.bf16.mxu1 %v2900_v0 }
 0xbf4   :  { %2446 = vmatpush3.bf16.msra.mxu1 %v1432_v34 }
 0xbf5   :  { %2447 = vmatprep.subr.bf16.mxu1 %v2900_v0 }
 0xbf8   :  { %2448 = vmatpush3.bf16.msra.mxu1 %v1359_v7 }
 0xbf9   :  { %2465 = vmatprep.subr.bf16.mxu1 %v2900_v0 }
 0xca3   :  { %v1327_v8 = vpop.f32.mrf.mxu1  ;;  %v1400_v9 = vpop.f32.mrf.mxu0 }
 0xca4   :  { %v1401_v10 = vadd.f32 %v1400_v9, %v3174_v17  ;;  %v1328_v45 = vadd.f32 %v1327_v8, %v3174_v17 }
 0xca5   :  { %v2421_v33 = vpop.f32.mrf.mxu1  ;;  %v2427_v11 = vpop.f32.mrf.mxu0 }
 0xca6   :  { %v1407_v12 = vsel %vm489_vm15, %v1401_v10, -inf  ;;  %v1334_v48 = vsel %vm489_vm15, %v1328_v45, -inf }
 0xca7   :  { %v1330_v13 = vpop.f32.mrf.mxu1  ;;  %1408 = vmax.xlane.f32.xlu0 %v1407_v12  ;;  %v1403_v15 = vpop.f32.mrf.mxu0 }
 0xca8   :  { %v1404_v32 = vadd.f32 %v1403_v15, %v3176_v23  ;;  %v1331_v47 = vadd.f32 %v1330_v13, %v3176_v23 }
 0xca9   :  { %v2422_v16 = vpop.f32.mrf.mxu1  ;;  %v2428_v18 = vpop.f32.mrf.mxu0 }
 0xcaa   :  { %v1410_v21 = vsel %vm489_vm15, %v1404_v32, -inf  ;;  %v1337_v49 = vsel %vm489_vm15, %v1331_v47, -inf }
 0xcab   :  { %v1473_v22 = vpop.f32.mrf.mxu1  ;;  %1411 = vmax.xlane.f32.xlu0 %v1410_v21  ;;  %v1546_v27 = vpop.f32.mrf.mxu0 }
 0xcac   :  { %v1474_v28 = vadd.f32 %v1473_v22, %v3174_v17  ;;  %v1547_v25 = vadd.f32 %v1546_v27, %v3174_v17 }
 0xcad   :  { %v2433_v29 = vpop.f32.mrf.mxu1  ;;  %v2439_v30 = vpop.f32.mrf.mxu0 }
 0xcae   :  { %v1480_v31 = vsel %vm489_vm15, %v1474_v28, -inf  ;;  %v1553_v36 = vsel %vm489_vm15, %v1547_v25, -inf }
 0xcaf   :  { %v1476_v38 = vpop.f32.mrf.mxu1  ;;  %1481 = vmax.xlane.f32.xlu0 %v1480_v31  ;;  %1554 = vmax.xlane.f32.xlu1 %v1553_v36  ;;  %v1549_v39 = vpop.f32.mrf.mxu0 }
 0xcb0   :  { %v1477_v40 = vadd.f32 %v1476_v38, %v3176_v23  ;;  %v1550_v43 = vadd.f32 %v1549_v39, %v3176_v23 }
 0xcb1   :  { %v2434_v41 = vpop.f32.mrf.mxu1  ;;  %v2440_v42 = vpop.f32.mrf.mxu0 }
 0xcb2   :  { %v1483_v44 = vsel %vm489_vm15, %v1477_v40, -inf  ;;  %v1556_v46 = vsel %vm489_vm15, %v1550_v43, -inf  ;;  %v2573_v41 = vld [vmem:[%s3502_s6 + $0x38] sm:$0xff]  }
 0xcb3   :  { %1484 = vmax.xlane.f32.xlu0 %v1483_v44  ;;  %2454 = vmatpush3.bf16.msra.mxu0 %v2573_v41 }
 0xcb4   :  { %2455 = vmatprep.subr.bf16.mxu0 %v2900_v0 }
 0xcb7   :  { %1557 = vmax.xlane.f32.xlu0 %v1556_v46 }
 0xcbb   :  { %1335 = vmax.xlane.f32.xlu0 %v1334_v48 }
 0xcbf   :  { %1338 = vmax.xlane.f32.xlu0 %v1337_v49 }
 0xd30   :  { %v1409_v50 = vpop.xlane.xlu0 %1408 }
 0xd31   :  { %v1413_v52 = vsub.f32 %v1401_v10, %v1409_v50 }
 0xd33   :  { %v1415_v53 = vmul.f32 1.442695, %v1413_v52 }
 0xd34   :  { %v1412_v26 = vpop.xlane.xlu0 %1411 }
 0xd35   :  { %2633 = vpow2.f32 %v1415_v53  ;;  %v1414_v54 = vsub.f32 %v1404_v32, %v1412_v26 }
 0xd37   :  { %v1417_v55 = vmul.f32 1.442695, %v1414_v54 }
 0xd38   :  { %v1482_v56 = vpop.xlane.xlu0 %1481  ;;  %v1555_v17 = vpop.xlane.xlu1 %1554 }
 0xd39   :  { %2635 = vpow2.f32 %v1417_v55  ;;  %v1486_v57 = vsub.f32 %v1474_v28, %v1482_v56  ;;  %v1559_v58 = vsub.f32 %v1547_v25, %v1555_v17 }
 0xd3b   :  { %v1488_v59 = vmul.f32 1.442695, %v1486_v57  ;;  %v1561_v23 = vmul.f32 1.442695, %v1559_v58 }
 0xd3c   :  { %v1485_v19 = vpop.xlane.xlu0 %1484 }
 0xd3d   :  { %2637 = vpow2.f32 %v1488_v59  ;;  %v1487_v60 = vsub.f32 %v1477_v40, %v1485_v19 }
 0xd3e   :  { %2639 = vpow2.f32 %v1561_v23 }
 0xd3f   :  { %v1490_v61 = vmul.f32 1.442695, %v1487_v60 }
 0xd40   :  { %v1558_v62 = vpop.xlane.xlu0 %1557 }
 0xd41   :  { %v1560_v20 = vsub.f32 %v1550_v43, %v1558_v62  ;;  %2641 = vpow2.f32 %v1490_v61  ;;  %v2574_v43 = vld [vmem:[%s3502_s6 + $0x30] sm:$0xff]   ;;  %v2575_v62 = vld [vmem:[%s3502_s6 + $0x28] sm:$0xff]  }
 0xd42   :  { %v2634_v63 = vpop.eup %2633  ;;  %2456 = vmatpush3.bf16.msra.mxu0 %v2574_v43 }
 0xd43   :  { %v1563_v24 = vmul.f32 1.442695, %v1560_v20  ;;  %v1419_v51 = vsel %vm489_vm15, %v2634_v63, 0.0  ;;  %2457 = vmatprep.subr.bf16.mxu0 %v2900_v0  ;;  %v2576_v20 = vld [vmem:[%s3502_s6 + $0x20] sm:$0xff]  }
 0xd44   :  { %1420 = vadd.xlane.f32.xlu0 %v1419_v51  ;;  %v1336_v1 = vpop.xlane.xlu0 %1335 }
 0xd45   :  { %v1340_v2 = vsub.f32 %v1328_v45, %v1336_v1  ;;  %2643 = vpow2.f32 %v1563_v24 }
 0xd46   :  { %v2636_v35 = vpop.eup %2635  ;;  %2458 = vmatpush3.bf16.msra.mxu0 %v2575_v62 }
 0xd47   :  { %v1342_v3 = vmul.f32 1.442695, %v1340_v2  ;;  %v1422_v4 = vsel %vm489_vm15, %v2636_v35, 0.0  ;;  %2459 = vmatprep.subr.bf16.mxu0 %v2900_v0 }
 0xd48   :  { %1423 = vadd.xlane.f32.xlu0 %v1422_v4  ;;  %v1339_v5 = vpop.xlane.xlu0 %1338 }
 0xd49   :  { %2645 = vpow2.f32 %v1342_v3  ;;  %v1341_v34 = vsub.f32 %v1331_v47, %v1339_v5 }
 0xd4a   :  { %v2638_v6 = vpop.eup %2637  ;;  %2460 = vmatpush3.bf16.msra.mxu0 %v2576_v20 }
 0xd4b   :  { %v1344_v7 = vmul.f32 1.442695, %v1341_v34  ;;  %v1492_v8 = vsel %vm489_vm15, %v2638_v6, 0.0  ;;  %v2640_v9 = vpop.eup %2639  ;;  %2477 = vmatprep.subr.bf16.mxu0 %v2900_v0 }
 0xd4c   :  { %1493 = vadd.xlane.f32.xlu0 %v1492_v8  ;;  %v1565_v10 = vsel %vm489_vm15, %v2640_v9, 0.0 }
 0xd4d   :  { %2647 = vpow2.f32 %v1344_v7 }
 0xd4e   :  { %v2642_v33 = vpop.eup %2641 }
 0xd4f   :  { %v1495_v11 = vsel %vm489_vm15, %v2642_v33, 0.0 }
 0xd50   :  { %1566 = vadd.xlane.f32.xlu0 %v1565_v10 }
 0xd52   :  { %v2644_v12 = vpop.eup %2643 }
 0xd53   :  { %v1568_v15 = vsel %vm489_vm15, %v2644_v12, 0.0 }
 0xd54   :  { %1496 = vadd.xlane.f32.xlu0 %v1495_v11 }
 0xd56   :  { %v2646_v13 = vpop.eup %2645 }
 0xd57   :  { %v1346_v32 = vsel %vm489_vm15, %v2646_v13, 0.0 }
 0xd58   :  { %1569 = vadd.xlane.f32.xlu0 %v1568_v15  ;;  %1347 = vadd.xlane.f32.xlu1 %v1346_v32 }
 0xd5a   :  { %v2648_v16 = vpop.eup %2647 }
 0xd5b   :  { %v1349_v18 = vsel %vm489_vm15, %v2648_v16, 0.0 }
 0xd5c   :  { %1350 = vadd.xlane.f32.xlu0 %v1349_v18 }
 0xdcd   :  { %v1421_v21 = vpop.xlane.xlu0 %1420 }
 0xdce   :  { %2649 = vrcp.f32 %v1421_v21 }
 0xdd1   :  { %v1424_v22 = vpop.xlane.xlu0 %1423 }
 0xdd2   :  { %2651 = vrcp.f32 %v1424_v22 }
 0xdd5   :  { %v1494_v27 = vpop.xlane.xlu0 %1493 }
 0xdd6   :  { %2653 = vrcp.f32 %v1494_v27  ;;  %v2577_v27 = vld [vmem:[#allocation13 + $0x38] sm:$0xff]  }
 0xdd9   :  { %v1567_v28 = vpop.xlane.xlu0 %1566 }
 0xddb   :  { %v2650_v25 = vpop.eup %2649 }
 0xddc   :  { %v1426_v31 = vmul.f32 %v2650_v25, %v2634_v63  ;;  %v2580_v25 = vld [vmem:[#allocation13 + $0x20] sm:$0xff]  }
 0xddd   :  { %v1497_v29 = vpop.xlane.xlu0 %1496 }
 0xdde   :  { %2655 = vrcp.f32 %v1497_v29  ;;  %v2581_v29 = vld [vmem:[%s3508_s12 + $0x78] sm:$0xff]  }
 0xddf   :  { %v2652_v30 = vpop.eup %2651  ;;  %2657 = vrcp.f32 %v1567_v28  ;;  %v2579_v28 = vld [vmem:[#allocation13 + $0x28] sm:$0xff]  }
 0xde0   :  { %v1428_v36 = vmul.f32 %v2652_v30, %v2636_v35  ;;  %v2208_v35 = vld [vmem:[#allocation8 + $0x1] ss:$0 sm:$0xff]  ;;  %v2582_v30 = vld [vmem:[%s3508_s12 + $0x70] sm:$0xff]  }
 0xde1   :  { %v1570_v38 = vpop.xlane.xlu0 %1569  ;;  %v1348_v26 = vpop.xlane.xlu1 %1347 }
 0xde2   :  { %v1429_v39 = vpack.c.bf16 %v1428_v36, %v1426_v31  ;;  %2659 = vrcp.f32 %v1570_v38  ;;  %v2583_v31 = vld [vmem:[%s3508_s12 + $0x68] sm:$0xff]   ;;  %v2584_v36 = vld [vmem:[%s3508_s12 + $0x60] sm:$0xff]   ;;  %v2585_v38 = vld [vmem:[%s3508_s12 + $0x58] sm:$0xff]  }
 0xde3   :  { %v2654_v40 = vpop.eup %2653 }
 0xde4   :  { %1580 = vrot.lane.b32.xlu1 %v1429_v39, %s2889_s23  ;;  %v1499_v44 = vmul.f32 %v2654_v40, %v2638_v6 }
 0xde5   :  { %v1351_v53 = vpop.xlane.xlu0 %1350 }
 0xde6   :  { %2661 = vrcp.f32 %v1351_v53 }
 0xde7   :  { %2663 = vrcp.f32 %v1348_v26 }
 0xdeb   :  { %v2656_v42 = vpop.eup %2655 }
 0xdec   :  { %v1501_v45 = vmul.f32 %v2656_v42, %v2642_v33  ;;  %v2658_v46 = vpop.eup %2657 }
 0xded   :  { %v1572_v49 = vmul.f32 %v2658_v46, %v2640_v9 }
 0xdee   :  { %v1502_v47 = vpack.c.bf16 %v1501_v45, %v1499_v44 }
 0xdef   :  { %v2660_v48 = vpop.eup %2659 }
 0xdf0   :  { %1583 = vrot.lane.b32.xlu0 %v1502_v47, %s2904_s24  ;;  %v1574_v50 = vmul.f32 %v2660_v48, %v2644_v12  ;;  %v2214_v47 = vld [vmem:[#allocation10 + $0x1] ss:$0 sm:$0xff] }
 0xdf2   :  { %v1575_v52 = vpack.c.bf16 %v1574_v50, %v1572_v49 }
 0xdf3   :  { %v2662_v54 = vpop.eup %2661 }
 0xdf4   :  { %1586 = vrot.lane.b32.xlu1 %v1575_v52, %s2905_s20  ;;  %v2664_v55 = vpop.eup %2663  ;;  %v1355_v56 = vmul.f32 %v2662_v54, %v2648_v16  ;;  %v2215_v52 = vld [vmem:[#allocation11 + $0x1] ss:$0 sm:$0xff] }
 0xdf5   :  { %v1353_v17 = vmul.f32 %v2664_v55, %v2646_v13 }
 0xdf7   :  { %v1356_v58 = vpack.c.bf16 %v1355_v56, %v1353_v17  ;;  %v2586_v56 = vld [vmem:[%s3508_s12 + $0x50] sm:$0xff]   ;;  %v2587_v17 = vld [vmem:[%s3508_s12 + $0x48] sm:$0xff]  }
 0xe56   :  { %v1581_v57 = vpop.permute.xlu1 %1580 }
 0xe57   :  { %v1590_v23 = vsel %vm489_vm15, %v1356_v58, %v1581_v57  ;;  %v2588_v57 = vld [vmem:[%s3508_s12 + $0x40] sm:$0xff]   ;;  %v2216_v58 = vld [vmem:[#allocation14 + $0x1] ss:$0 sm:$0xff] }
 0xe62   :  { %v1584_v59 = vpop.permute.xlu0 %1583 }
 0xe63   :  { %v1592_v19 = vsel %vm207_vm1, %v1590_v23, %v1584_v59 }
 0xe66   :  { %v1587_v60 = vpop.permute.xlu1 %1586 }
 0xe67   :  { %v1594_v61 = vsel %vm749_vm3, %v1592_v19, %v1587_v60 }
 0xe68   :  { %2450 = vmatmul.mubr.msk.bf16.vlgmr.msra.gmra.mxu1 %vm388_vm2, %v1594_v61 }
 0xe69   :  { %2473 = vmatprep.mubr.msk.bf16.mxu1 %vm2901_vm0, %v2900_v0  ;;  %2466 = vmatpush3.bf16.msra.mxu1 %v2577_v27  ;;  %v2592_v27 = vld [vmem:[%s3512_s16] sm:$0xff]  }
 0xe6a   :  { %2467 = vmatprep.subr.bf16.mxu1 %v2900_v0 }
 0xf28   :  { %v1631_v63 = vpop.f32.mrf.mxu1 }
 0xf2a   :  { %v2451_v24 = vpop.f32.mrf.mxu1 }
 0xf2c   :  { %v1634_v51 = vpop.f32.mrf.mxu1 }
 0xf2d   :  { %v1638_v1 = vpack.c.bf16 %v1634_v51, %v1631_v63  ;;  %v2238_v51 = vld [vmem:[#allocation16 + $0x1] ss:$0 sm:$0xff] }
 0xf2e   :  { %v2452_v2 = vpop.f32.mrf.mxu1 }
 0xf2f   :  { %2462 = vmatmul.mubr.msk.bf16.vlgmr.msra.gmra.mxu0 %vm388_vm2, %v1638_v1 }
 0xf30   :  { %2493 = vmatprep.mubr.msk.bf16.mxu0 %vm2901_vm0, %v2900_v0  ;;  %2478 = vmatpush3.bf16.msra.mxu0 %v2581_v29 }
 0xf31   :  { %2479 = vmatprep.subr.bf16.mxu0 %v2900_v0 }
 0xf34   :  { %2480 = vmatpush3.bf16.msra.mxu0 %v2582_v30 }
 0xf35   :  { %2481 = vmatprep.subr.bf16.mxu0 %v2900_v0 }
 0xf38   :  { %2482 = vmatpush3.bf16.msra.mxu0 %v2583_v31 }
 0xf39   :  { %2483 = vmatprep.subr.bf16.mxu0 %v2900_v0 }
 0xf3c   :  { %2484 = vmatpush3.bf16.msra.mxu0 %v2584_v36 }
 0xf3d   :  { %2485 = vmatprep.subr.bf16.mxu0 %v2900_v0 }
 0xf40   :  { %2486 = vmatpush3.bf16.msra.mxu0 %v2585_v38 }
 0xf41   :  { %2487 = vmatprep.subr.bf16.mxu0 %v2900_v0 }
 0xf44   :  { %2488 = vmatpush3.bf16.msra.mxu0 %v2586_v56 }
 0xf45   :  { %2489 = vmatprep.subr.bf16.mxu0 %v2900_v0 }
 0xf48   :  { %2490 = vmatpush3.bf16.msra.mxu0 %v2587_v17 }
 0xf49   :  { %2491 = vmatprep.subr.bf16.mxu0 %v2900_v0 }
 0xf4c   :  { %2492 = vmatpush3.bf16.msra.mxu0 %v2588_v57 }
 0xfef   :  { %v1717_v3 = vpop.f32.mrf.mxu0 }
 0xff0   :  { %v1718_v4 = vadd.f32 %v2208_v35, %v1717_v3 }
 0xff1   :  { %v2463_v5 = vpop.f32.mrf.mxu0 }
 0xff2   :  { %v1724_v34 = vadd.f32 %v1718_v4, %v3310_v37 }
 0xff3   :  { %v1720_v6 = vpop.f32.mrf.mxu0 }
 0xff4   :  { %v1721_v7 = vadd.f32 %v2208_v35, %v1720_v6  ;;  %v1730_v8 = vsel %vm388_vm2, %v1724_v34, 0.0 }
 0xff5   :  { %1731 = vadd.xlane.f32.xlu1 %v1730_v8  ;;  %v2464_v9 = vpop.f32.mrf.mxu0 }
 0xff6   :  { %v1725_v10 = vadd.f32 %v1721_v7, %v3312_v14  ;;  %v2578_v14 = vld [vmem:[#allocation13 + $0x30] sm:$0xff]  }
 0xff7   :  { %2468 = vmatpush3.bf16.msra.mxu1 %v2578_v14 }
 0xff8   :  { %v1733_v33 = vsel %vm388_vm2, %v1725_v10, 0.0  ;;  %2469 = vmatprep.subr.bf16.mxu1 %v2900_v0 }
 0xff9   :  { %1734 = vadd.xlane.f32.xlu0 %v1733_v33 }
 0xffb   :  { %2470 = vmatpush3.bf16.msra.mxu1 %v2579_v28 }
 0xffc   :  { %2471 = vmatprep.subr.bf16.mxu1 %v2900_v0 }
 0xfff   :  { %2472 = vmatpush3.bf16.msra.mxu1 %v2580_v25 }
0x1000   :  { %2497 = vmatprep.subr.bf16.mxu1 %v2900_v0 }
0x107e   :  { %v1732_v11 = vpop.xlane.xlu1 %1731 }
0x107f   :  { %v1736_v12 = vmul.f32 0.015625, %v1732_v11 }
0x1081   :  { %v1738_v13 = vsub.f32 %v1724_v34, %v1736_v12 }
0x1082   :  { %v1735_v15 = vpop.xlane.xlu0 %1734 }
0x1083   :  { %v1737_v32 = vmul.f32 0.015625, %v1735_v15  ;;  %v1740_v16 = vmul.f32 %v1738_v13, %v1738_v13 }
0x1085   :  { %v1739_v18 = vsub.f32 %v1725_v10, %v1737_v32  ;;  %v1742_v37 = vsel %vm388_vm2, %v1740_v16, 0.0 }
0x1086   :  { %1743 = vadd.xlane.f32.xlu0 %v1742_v37  ;;  %v2589_v37 = vld [vmem:[%s3512_s16 + $0x18] sm:$0xff]  }
0x1087   :  { %v1741_v21 = vmul.f32 %v1739_v18, %v1739_v18 }
0x1089   :  { %v1745_v22 = vsel %vm388_vm2, %v1741_v21, 0.0  ;;  %v2590_v21 = vld [vmem:[%s3512_s16 + $0x10] sm:$0xff]  }
0x108a   :  { %1746 = vadd.xlane.f32.xlu1 %v1745_v22  ;;  %v2591_v22 = vld [vmem:[%s3512_s16 + $0x8] sm:$0xff]  }
0x110f   :  { %v1744_v39 = vpop.xlane.xlu0 %1743 }
0x1110   :  { %v1748_v40 = vmul.f32 0.015625, %v1744_v39  ;;  %v2249_v39 = vld [vmem:[%s3510_s14 + $0x1] ss:$0 sm:$0xff]  ;;  %s2906_s14 = smov [#allocation17]  }
0x1111   :  { %s2114_s11 = sshll.u32 %s2906_s14, 4  ;;  %s2115_s11 = int_to_ptr.vmem [resolvable:$true] %s2114_s11 }
0x1112   :  { %v1750_v41 = vadd.f32 1e-05, %v1748_v40  ;;  %p2858_p4 = scmp.lt.s32.totalorder %s2115_s11, %s2115_s11 }
0x1113   :  { %v1747_v42 = vpop.xlane.xlu1 %1746 }
0x1114   :  { %2665 = vrsqrt.f32 %v1750_v41  ;;  %v1749_v43 = vmul.f32 0.015625, %v1747_v42 }
0x1116   :  { %v1751_v44 = vadd.f32 1e-05, %v1749_v43 }
0x1118   :  { %2667 = vrsqrt.f32 %v1751_v44 }
0x1121   :  { %v2666_v45 = vpop.eup %2665 }
0x1122   :  { %v1754_v46 = vmul.f32 %v2666_v45, %v1738_v13 }
0x1124   :  { %v1762_v50 = vmul.f32 %v2214_v47, %v1754_v46 }
0x1125   :  { %v2668_v48 = vpop.eup %2667 }
0x1126   :  { %v1755_v49 = vmul.f32 %v2668_v48, %v1739_v18  ;;  %v1770_v26 = vadd.f32 %v2215_v52, %v1762_v50 }
0x1128   :  { %v1763_v53 = vmul.f32 %v2214_v47, %v1755_v49  ;;  %v2251_v47 = vld [vmem:[%s3513_s17] ss:$0 sm:$0xff] }
0x112a   :  { %v1771_v54 = vadd.f32 %v2215_v52, %v1763_v53 }
0x112c   :  { %v1772_v55 = vpack.c.bf16 %v1771_v54, %v1770_v26 }
0x112e   :  { %2474 = vmatmul.mubr.msk.bf16.vlgmr.msra.gmra.mxu1 %vm388_vm2, %v1772_v55 }
0x112f   :  { %2505 = vmatprep.mubr.msk.bf16.mxu1 %vm2901_vm0, %v2900_v0  ;;  %2498 = vmatpush3.bf16.msra.mxu1 %v2589_v37 }
0x1130   :  { %2499 = vmatprep.subr.bf16.mxu1 %v2900_v0 }
0x1133   :  { %2500 = vmatpush3.bf16.msra.mxu1 %v2590_v21 }
0x1134   :  { %2501 = vmatprep.subr.bf16.mxu1 %v2900_v0 }
0x1137   :  { %2502 = vmatpush3.bf16.msra.mxu1 %v2591_v22 }
0x1138   :  { %2503 = vmatprep.subr.bf16.mxu1 %v2900_v0  ;;  %v2250_v0 = vld [vmem:[%s3511_s15 + $0x1] ss:$0 sm:$0xff]  ;;  %s2853_s15 = scalar_lea.vmem %s2115_s11, 256 }
0x1139   :  { %p2854_p3 = scmp.ne.s32.totalorder %s2115_s11, %s2853_s15  ;;  %p2859_p5 = scmp.lt.s32.totalorder %s2853_s15, %s2853_s15 }
0x113b   :  { %2504 = vmatpush3.bf16.msra.mxu1 %v2592_v27  ;;  %p2860_p6 = por %p2859_p5, %p2858_p4 }
0x113d   :  { %p2861_p7 = pnand %p2860_p6, %p2854_p3 }
0x11ee   :  { %v1851_v59 = vpop.f32.mrf.mxu1 }
0x11ef   :  { %v1852_v19 = vadd.f32 %v2216_v58, %v1851_v59 }
0x11f0   :  { %v2475_v23 = vpop.f32.mrf.mxu1 }
0x11f1   :  { %v1858_v20 = vmax.f32 %v1852_v19, 0.0 }
0x11f2   :  { %v1854_v60 = vpop.f32.mrf.mxu1 }
0x11f3   :  { %v1855_v61 = vadd.f32 %v2216_v58, %v1854_v60 }
0x11f4   :  { %v2476_v62 = vpop.f32.mrf.mxu1 }
0x11f5   :  { %v1859_v63 = vmax.f32 %v1855_v61, 0.0 }
0x11f7   :  { %v1860_v24 = vpack.c.bf16 %v1859_v63, %v1858_v20 }
0x11f9   :  { %2494 = vmatmul.mubr.bf16.vlgmr.msra.gmra.mxu0 %v1860_v24 }
0x12b9   :  { %v1968_v1 = vpop.f32.mrf.mxu0 }
0x12ba   :  { %v1969_v2 = vadd.f32 %v2238_v51, %v1968_v1 }
0x12bb   :  { %v2495_v35 = vpop.f32.mrf.mxu0 }
0x12bc   :  { %v1975_v3 = vadd.f32 %v1969_v2, %v1770_v26 }
0x12bd   :  { %v1971_v4 = vpop.f32.mrf.mxu0 }
0x12be   :  { %v1972_v5 = vadd.f32 %v2238_v51, %v1971_v4  ;;  %v1981_v34 = vsel %vm388_vm2, %v1975_v3, 0.0 }
0x12bf   :  { %1982 = vadd.xlane.f32.xlu0 %v1981_v34  ;;  %v2496_v6 = vpop.f32.mrf.mxu0 }
0x12c0   :  { %v1976_v7 = vadd.f32 %v1972_v5, %v1771_v54 }
0x12c2   :  { %v1984_v8 = vsel %vm388_vm2, %v1976_v7, 0.0 }
0x12c3   :  { %1985 = vadd.xlane.f32.xlu1 %v1984_v8 }
0x1348   :  { %v1983_v9 = vpop.xlane.xlu0 %1982 }
0x1349   :  { %v1987_v10 = vmul.f32 0.015625, %v1983_v9 }
0x134b   :  { %v1989_v33 = vsub.f32 %v1975_v3, %v1987_v10 }
0x134c   :  { %v1986_v11 = vpop.xlane.xlu1 %1985 }
0x134d   :  { %v1988_v12 = vmul.f32 0.015625, %v1986_v11  ;;  %v1991_v13 = vmul.f32 %v1989_v33, %v1989_v33 }
0x134f   :  { %v1990_v15 = vsub.f32 %v1976_v7, %v1988_v12  ;;  %v1993_v32 = vsel %vm388_vm2, %v1991_v13, 0.0 }
0x1350   :  { %1994 = vadd.xlane.f32.xlu0 %v1993_v32 }
0x1351   :  { %v1992_v16 = vmul.f32 %v1990_v15, %v1990_v15 }
0x1353   :  { %v1996_v18 = vsel %vm388_vm2, %v1992_v16, 0.0 }
0x1354   :  { %1997 = vadd.xlane.f32.xlu1 %v1996_v18 }
0x13d9   :  { %v1995_v14 = vpop.xlane.xlu0 %1994 }
0x13da   :  { %v1999_v28 = vmul.f32 0.015625, %v1995_v14 }
0x13dc   :  { %v2001_v25 = vadd.f32 1e-05, %v1999_v28 }
0x13dd   :  { %v1998_v29 = vpop.xlane.xlu1 %1997 }
0x13de   :  { %2669 = vrsqrt.f32 %v2001_v25  ;;  %v2000_v30 = vmul.f32 0.015625, %v1998_v29 }
0x13e0   :  { %v2002_v31 = vadd.f32 1e-05, %v2000_v30 }
0x13e2   :  { %2671 = vrsqrt.f32 %v2002_v31 }
0x13eb   :  { %v2670_v36 = vpop.eup %2669 }
0x13ec   :  { %v2005_v38 = vmul.f32 %v2670_v36, %v1989_v33 }
0x13ee   :  { %v2013_v42 = vmul.f32 %v2249_v39, %v2005_v38 }
0x13ef   :  { %v2672_v40 = vpop.eup %2671 }
0x13f0   :  { %v2006_v41 = vmul.f32 %v2672_v40, %v1990_v15  ;;  %v2021_v44 = vadd.f32 %v2250_v0, %v2013_v42 }
0x13f2   :  { %v2014_v43 = vmul.f32 %v2249_v39, %v2006_v41 }
0x13f4   :  { %v2022_v45 = vadd.f32 %v2250_v0, %v2014_v43 }
0x13f6   :  { %v2023_v46 = vpack.c.bf16 %v2022_v45, %v2021_v44 }
0x13f8   :  { %2506 = vmatmul.mubr.msk.bf16.vlgmr.msra.gmra.mxu1 %vm388_vm2, %v2023_v46 }
0x14b8   :  { %v2100_v48 = vpop.f32.mrf.mxu1 }
0x14b9   :  { %v2101_v49 = vadd.f32 %v2251_v47, %v2100_v48 }
0x14ba   :  { %v2507_v50 = vpop.f32.mrf.mxu1 }
0x14bb   :  { %2107 = vst.msk [vmem:[#allocation17] sm:$0xff] %vm207_vm1, %v2101_v49 }
0x14bc   :  { %v2103_v52 = vpop.f32.mrf.mxu1 }
0x14bd   :  { %v2104_v53 = vadd.f32 %v2251_v47, %v2103_v52 }
0x14be   :  { %v2508_v26 = vpop.f32.mrf.mxu1 }
0x14bf   :  { %2108 = vst.msk [vmem:[#allocation17 + $0x8] sm:$0xff] %vm207_vm1, %v2104_v53 }
0x14c0   :  { %2864 = shalt.err (!%p2861_p7)
}
0x14c1   :  { %2120 = dma.vmem_to_hbm [thread:$0]  %s2115_s11, 256, %s3514_s18, [#allocation4], %s2894_s9, %s2894_s9, %s2895_s28  }
0x14c2   :  { %2883 = dma.done.wait [#allocation4], 256  }
0x14c3   :  { %2884 = vsyncadd [#allocation4], 4294967040 }
0x14c4   :  { %2124 = vsyncpa [#allocation3], 1 }
0x14c5   :  { %2125 = vsyncpa [#allocation6], 1 }
0x14c6   :  { %2126 = vsyncpa [#allocation9], 1 }
0x14c7   :  { %2127 = vsyncpa [#allocation12], 1 }
0x14c8   :  { %2128 = vsyncpa [#allocation15], 1 }
0x14c9   :  { %2129 = vsyncpa [#allocation4], 1 }

</bundles_post_ra>
